<compile_context>
chip_gen: v7x
topology: tpu7x:2x2x1
jax: 0.10.0
libtpu: 0.0.40
codegen_flags: <defaults>
</compile_context>

<pallas_src>
import functools
from typing import NamedTuple

import jax
import jax.numpy as jnp
from jax.experimental import pallas as pl
from jax.experimental.pallas import tpu as pltpu


def _round_up(n, m):
    return ((n + m - 1) // m) * m


# ---------------------------------------------------------------------------
# Kernel: whole MLP fused over one row tile.
# ---------------------------------------------------------------------------
def _mlp_kernel(num_layers, x_ref, *refs):
    # refs layout: w_0, b_0, w_1, b_1, ..., w_{L-1}, b_{L-1}, out_ref
    out_ref = refs[-1]
    param_refs = refs[:-1]

    h = x_ref[...]
    for i in range(num_layers):
        w = param_refs[2 * i][...]        # (in_p, out_p) — pre-transposed on host
        b = param_refs[2 * i + 1][...]    # (1, out_p)    — pre-cast to f32
        if h.dtype != w.dtype:
            h = h.astype(w.dtype)
        acc = jnp.dot(h, w, preferred_element_type=jnp.float32) + b
        h = jnp.maximum(acc, 0.0) if i < num_layers - 1 else acc
    out_ref[...] = h.astype(out_ref.dtype)


# ---------------------------------------------------------------------------
# Host-side parameter preparation (do once, cache, reuse every forward).
# ---------------------------------------------------------------------------
class MLPParams(NamedTuple):
    params: tuple          # (w0, b0, w1, b1, ...) padded, (in, out) layout
    d_in: int
    d_out: int
    d_in_p: int
    dims_out_p: tuple
    compute_dtype: jnp.dtype


def prepare_mlp_params(weights, biases, *, lane_pad=128, compute_dtype="auto"):
    """Transpose W to (in, out), zero-pad feature dims to lane multiples and
    cast to the compute dtype once.  Padded rows/cols are zero, so the math is
    unchanged (0-lanes stay inert through matmul/bias/ReLU)."""
    if compute_dtype == "auto":
        compute_dtype = (jnp.bfloat16 if weights[0].dtype == jnp.float32
                         else weights[0].dtype)
    compute_dtype = jnp.dtype(compute_dtype)

    d_in = weights[0].shape[1]
    d_in_p = _round_up(d_in, lane_pad)
    dims_out = [w.shape[0] for w in weights]
    dims_out_p = [_round_up(o, lane_pad) for o in dims_out]
    dims_in_p = [d_in_p] + dims_out_p[:-1]

    params = []
    for w, b, in_p, out_p in zip(weights, biases, dims_in_p, dims_out_p):
        out_l, in_l = w.shape
        wt = jnp.zeros((in_p, out_p), compute_dtype)
        wt = wt.at[:in_l, :out_l].set(w.T.astype(compute_dtype))
        bp = jnp.zeros((1, out_p), jnp.float32)
        bp = bp.at[0, :out_l].set(b.astype(jnp.float32))
        params.append(wt)
        params.append(bp)

    return MLPParams(tuple(params), d_in, dims_out[-1], d_in_p,
                     tuple(dims_out_p), compute_dtype)


# ---------------------------------------------------------------------------
# Forward.
# ---------------------------------------------------------------------------
def mlp_pallas(x, weights=None, biases=None, *, prepared=None,
               row_tile=1024, lane_pad=128, compute_dtype="auto",
               vmem_limit_bytes=None):
    """Fused MLP forward.  x: (..., input_dim).

    Either pass raw PyTorch-convention (weights, biases) — they will be
    prepared on the fly — or pass `prepared=prepare_mlp_params(...)` to avoid
    the per-call transpose/pad/cast pass over the weights.
    """
    if prepared is None:
        prepared = prepare_mlp_params(weights, biases, lane_pad=lane_pad,
                                      compute_dtype=compute_dtype)

    params = prepared.params
    num_layers = len(params) // 2
    d_in, d_out = prepared.d_in, prepared.d_out
    d_in_p, dims_out_p = prepared.d_in_p, prepared.dims_out_p
    d_out_p = dims_out_p[-1]

    orig_dtype = x.dtype
    lead_shape = x.shape[:-1]
    x2d = x.reshape(-1, d_in)
    n_rows = x2d.shape[0]

    # ------------------- generation-aware VMEM budget ----------------------
    try:
        vmem_cap = int(pltpu.get_tpu_info().vmem_capacity_bytes)
    except Exception:
        vmem_cap = 128 * 1024 * 1024
    if vmem_limit_bytes is None:
        # ~100 MiB on 128-MiB chips (v5e/v6e), ~51 MiB on 64-MiB v7x.
        vmem_limit_bytes = min(int(vmem_cap * 0.8), 100 * 1024 * 1024)

    in_sz = jnp.dtype(orig_dtype).itemsize
    out_sz = jnp.dtype(orig_dtype).itemsize
    weight_bytes = sum(p.size * p.dtype.itemsize for p in params)  # Buffered(1)
    max_feat_p = max([d_in_p] + list(dims_out_p))
    per_row_bytes = (2 * d_in_p * in_sz            # input double buffer
                     + 2 * d_out_p * out_sz        # output double buffer
                     + 3 * max_feat_p * 4)         # f32 acc/bias/ReLU temporaries
    reserve = 4 * 1024 * 1024
    tm_budget = max((vmem_limit_bytes - weight_bytes - reserve) // per_row_bytes, 8)

    # >= 2 grid steps so ("parallel",) can shard across v7x's 2 TensorCores
    # (negligible cost on single-TC v5e/v6e).
    n_rows_eff = max(n_rows, 1)
    two_step_cap = _round_up(pl.cdiv(n_rows_eff, 2), 8) if n_rows_eff > 8 else 8

    tm = min(int(row_tile), int(tm_budget), two_step_cap,
             _round_up(n_rows_eff, 8))
    tm = max(8, (tm // 8) * 8)

    n_pad = _round_up(n_rows_eff, tm)
    grid = (n_pad // tm,)

    # ------------------- input padding (skipped when aligned) --------------
    if n_pad == n_rows and d_in_p == d_in:
        x_p = x2d
    else:
        x_p = jnp.zeros((n_pad, d_in_p), x2d.dtype).at[:n_rows, :d_in].set(x2d)

    # ------------------- specs ---------------------------------------------
    # TODO(synk): for very large hidden dims (f32 weights, hidden >= 4096) the
    # resident weights approach v7x's VMEM; tile the fat layer's weight over an
    # "arbitrary" grid axis with a VMEM accumulator instead of full residency.
    x_spec = pl.BlockSpec((tm, d_in_p), lambda i: (i, 0))
    out_spec = pl.BlockSpec((tm, d_out_p), lambda i: (i, 0))

    def _param_specs(single_buffer):
        specs = []
        for p in params:
            if single_buffer:
                specs.append(pl.BlockSpec(p.shape, lambda i: (0, 0),
                                          pipeline_mode=pl.Buffered(1)))
            else:
                specs.append(pl.BlockSpec(p.shape, lambda i: (0, 0)))
        return specs

    # ------------------- advisory cost estimate ----------------------------
    dims_in_p = [d_in_p] + list(dims_out_p[:-1])
    flops = 2 * n_pad * sum(i_p * o_p for i_p, o_p in zip(dims_in_p, dims_out_p))
    bytes_accessed = int(x_p.size * x_p.dtype.itemsize
                         + weight_bytes
                         + n_pad * d_out_p * out_sz)
    cost = pl.CostEstimate(flops=int(flops), transcendentals=0,
                           bytes_accessed=bytes_accessed)

    def _build(single_buffer):
        return pl.pallas_call(
            functools.partial(_mlp_kernel, num_layers),
            out_shape=jax.ShapeDtypeStruct((n_pad, d_out_p), orig_dtype),
            grid_spec=pltpu.PrefetchScalarGridSpec(
                num_scalar_prefetch=0,
                grid=grid,
                in_specs=[x_spec] + _param_specs(single_buffer),
                out_specs=out_spec,
            ),
            compiler_params=pltpu.CompilerParams(
                dimension_semantics=("parallel",),
                vmem_limit_bytes=int(vmem_limit_bytes),
            ),
            cost_estimate=cost,
        )

    try:
        y2d = _build(True)(x_p, *params)
    except Exception:
        # Some JAX versions reject Buffered(1) on top-level pallas_call inputs;
        # fall back to default double-buffering (only costs extra VMEM).
        y2d = _build(False)(x_p, *params)

    # ------------------- strip padding (skipped when aligned) --------------
    if n_pad == n_rows and d_out_p == d_out:
        y = y2d
    else:
        y = y2d[:n_rows, :d_out]
    return y.reshape(*lead_shape, d_out)


# ---------------------------------------------------------------------------
# Reference + init helpers.
# ---------------------------------------------------------------------------
def init_mlp_params(key, input_dim, hidden_dim, output_dim, num_layers):
    """Deterministic init matching nn.Linear shapes (W: (out,in), b: (out,))."""
    h = [hidden_dim] * (num_layers - 1)
    dims_in = [input_dim] + h
    dims_out = h + [output_dim]
    weights, biases = [], []
    for n, k in zip(dims_in, dims_out):
        key, kw, kb = jax.random.split(key, 3)
        bound = 1.0 / jnp.sqrt(n)
        weights.append(jax.random.uniform(kw, (k, n), jnp.float32, -bound, bound))
        biases.append(jax.random.uniform(kb, (k,), jnp.float32, -bound, bound))
    return weights, biases


def mlp_reference(x, weights, biases):
    h = x
    L = len(weights)
    for i, (w, b) in enumerate(zip(weights, biases)):
        h = h @ w.T + b
        if i < L - 1:
            h = jnp.maximum(h, 0.0)
    return h


if __name__ == "__main__":
    key = jax.random.PRNGKey(0)
    key, kx = jax.random.split(key)

    batch, seq = 2, 8
    input_dim, hidden_dim, output_dim, num_layers = 32, 64, 16, 3

    x = jax.random.normal(kx, (batch, seq, input_dim), jnp.float32)
    weights, biases = init_mlp_params(key, input_dim, hidden_dim,
                                      output_dim, num_layers)
    y_ref = mlp_reference(x, weights, biases)

    # 1) f32 compute path — bitwise-close to the reference.
    prep_f32 = prepare_mlp_params(weights, biases, compute_dtype=jnp.float32)
    y = jax.block_until_ready(mlp_pallas(x, prepared=prep_f32))
    assert y.shape == (batch, seq, output_dim)
    assert y.dtype == x.dtype
    assert jnp.allclose(y, y_ref, atol=1e-4, rtol=1e-4), "mismatch (f32 path)"

    # 2) Default bf16-compute path (cached/prepared params, f32 accumulation).
    prep_bf16 = prepare_mlp_params(weights, biases)          # auto -> bf16
    y_bf = jax.block_until_ready(mlp_pallas(x, prepared=prep_bf16))
    assert y_bf.dtype == x.dtype
    assert jnp.allclose(y_bf, y_ref, atol=3e-2, rtol=3e-2), "mismatch (bf16 path)"

    # 3) Non-tile-aligned row count — exercises the pad-and-slice path.
    x2 = jax.random.normal(kx, (3, 7, input_dim), jnp.float32)
    y2 = jax.block_until_ready(mlp_pallas(x2, prepared=prep_f32))
    assert jnp.allclose(y2, mlp_reference(x2, weights, biases),
                        atol=1e-4, rtol=1e-4), "mismatch on padded-row path"

    print("KERNEL_OK")
</pallas_src>

<mosaic_0001>
module attributes {stable_mosaic.version = 11 : i64} {
  func.func @_mlp_kernel(%arg0: i32, %arg1: memref<8x128xf32, #tpu.memory_space<vmem>>, %arg2: memref<128x128xf32, #tpu.memory_space<vmem>>, %arg3: memref<1x128xf32, #tpu.memory_space<vmem>>, %arg4: memref<128x128xf32, #tpu.memory_space<vmem>>, %arg5: memref<1x128xf32, #tpu.memory_space<vmem>>, %arg6: memref<128x128xf32, #tpu.memory_space<vmem>>, %arg7: memref<1x128xf32, #tpu.memory_space<vmem>>, %arg8: memref<8x128xf32, #tpu.memory_space<vmem>>) attributes {dimension_semantics = [#tpu.dimension_semantics<parallel>], iteration_bounds = array<i64: 2>, scalar_prefetch = 0 : i64, scratch_operands = 0 : i64, tpu.core_type = #tpu.core_type<tc>, window_params = [{transform_indices = @transform_0, window_bounds = array<i64: 8, 128>}, {pipeline_mode = #tpu.pipeline_mode<synchronous>, transform_indices = @transform_1, window_bounds = array<i64: 128, 128>}, {pipeline_mode = #tpu.pipeline_mode<synchronous>, transform_indices = @transform_2, window_bounds = array<i64: 1, 128>}, {pipeline_mode = #tpu.pipeline_mode<synchronous>, transform_indices = @transform_3, window_bounds = array<i64: 128, 128>}, {pipeline_mode = #tpu.pipeline_mode<synchronous>, transform_indices = @transform_4, window_bounds = array<i64: 1, 128>}, {pipeline_mode = #tpu.pipeline_mode<synchronous>, transform_indices = @transform_5, window_bounds = array<i64: 128, 128>}, {pipeline_mode = #tpu.pipeline_mode<synchronous>, transform_indices = @transform_6, window_bounds = array<i64: 1, 128>}, {transform_indices = @transform_7, window_bounds = array<i64: 8, 128>}]} {
    %c0 = arith.constant 0 : index
    %c0_0 = arith.constant 0 : index
    %0 = vector.load %arg1[%c0, %c0_0] : memref<8x128xf32, #tpu.memory_space<vmem>>, vector<8x128xf32>
    %c0_1 = arith.constant 0 : index
    %c0_2 = arith.constant 0 : index
    %1 = vector.load %arg2[%c0_1, %c0_2] : memref<128x128xf32, #tpu.memory_space<vmem>>, vector<128x128xf32>
    %c0_3 = arith.constant 0 : index
    %c0_4 = arith.constant 0 : index
    %2 = vector.load %arg3[%c0_3, %c0_4] : memref<1x128xf32, #tpu.memory_space<vmem>>, vector<1x128xf32>
    %cst = arith.constant dense<0.000000e+00> : vector<8x128xf32>
    %3 = tpu.matmul %0, %1, %cst {dimension_numbers = #tpu.dot_dimension_numbers<[1], [0], [0], [1], [0, 0, 1, 1], [], []>} : vector<8x128xf32>, vector<128x128xf32>, vector<8x128xf32> -> vector<8x128xf32>
    %4 = vector.broadcast %2 : vector<1x128xf32> to vector<8x128xf32>
    %5 = arith.addf %3, %4 : vector<8x128xf32>
    %cst_5 = arith.constant 0.000000e+00 : f32
    %6 = vector.broadcast %cst_5 : f32 to vector<8x128xf32>
    %7 = arith.maximumf %5, %6 : vector<8x128xf32>
    %c0_6 = arith.constant 0 : index
    %c0_7 = arith.constant 0 : index
    %8 = vector.load %arg4[%c0_6, %c0_7] : memref<128x128xf32, #tpu.memory_space<vmem>>, vector<128x128xf32>
    %c0_8 = arith.constant 0 : index
    %c0_9 = arith.constant 0 : index
    %9 = vector.load %arg5[%c0_8, %c0_9] : memref<1x128xf32, #tpu.memory_space<vmem>>, vector<1x128xf32>
    %cst_10 = arith.constant dense<0.000000e+00> : vector<8x128xf32>
    %10 = tpu.matmul %7, %8, %cst_10 {dimension_numbers = #tpu.dot_dimension_numbers<[1], [0], [0], [1], [0, 0, 1, 1], [], []>} : vector<8x128xf32>, vector<128x128xf32>, vector<8x128xf32> -> vector<8x128xf32>
    %11 = vector.broadcast %9 : vector<1x128xf32> to vector<8x128xf32>
    %12 = arith.addf %10, %11 : vector<8x128xf32>
    %cst_11 = arith.constant 0.000000e+00 : f32
    %13 = vector.broadcast %cst_11 : f32 to vector<8x128xf32>
    %14 = arith.maximumf %12, %13 : vector<8x128xf32>
    %c0_12 = arith.constant 0 : index
    %c0_13 = arith.constant 0 : index
    %15 = vector.load %arg6[%c0_12, %c0_13] : memref<128x128xf32, #tpu.memory_space<vmem>>, vector<128x128xf32>
    %c0_14 = arith.constant 0 : index
    %c0_15 = arith.constant 0 : index
    %16 = vector.load %arg7[%c0_14, %c0_15] : memref<1x128xf32, #tpu.memory_space<vmem>>, vector<1x128xf32>
    %cst_16 = arith.constant dense<0.000000e+00> : vector<8x128xf32>
    %17 = tpu.matmul %14, %15, %cst_16 {dimension_numbers = #tpu.dot_dimension_numbers<[1], [0], [0], [1], [0, 0, 1, 1], [], []>} : vector<8x128xf32>, vector<128x128xf32>, vector<8x128xf32> -> vector<8x128xf32>
    %18 = vector.broadcast %16 : vector<1x128xf32> to vector<8x128xf32>
    %19 = arith.addf %17, %18 : vector<8x128xf32>
    %c0_17 = arith.constant 0 : index
    %c0_18 = arith.constant 0 : index
    %20 = vector.load %arg8[%c0_17, %c0_18] : memref<8x128xf32, #tpu.memory_space<vmem>>, vector<8x128xf32>
    tpu.vector_store %arg8[%c0_17, %c0_18], %19 {strides = array<i32>} : memref<8x128xf32, #tpu.memory_space<vmem>>, vector<8x128xf32>,
    return
  }
  func.func @transform_0(%arg0: i32) -> (i32, i32) {
    %c0_i32 = arith.constant 0 : i32
    %c0_i32_0 = arith.constant 0 : i32
    return %arg0, %c0_i32 : i32, i32
  }
  func.func @transform_1(%arg0: i32) -> (i32, i32) {
    %c0_i32 = arith.constant 0 : i32
    %c0_i32_0 = arith.constant 0 : i32
    %c0_i32_1 = arith.constant 0 : i32
    return %c0_i32, %c0_i32_0 : i32, i32
  }
  func.func @transform_2(%arg0: i32) -> (i32, i32) {
    %c0_i32 = arith.constant 0 : i32
    %c0_i32_0 = arith.constant 0 : i32
    %c0_i32_1 = arith.constant 0 : i32
    return %c0_i32, %c0_i32_0 : i32, i32
  }
  func.func @transform_3(%arg0: i32) -> (i32, i32) {
    %c0_i32 = arith.constant 0 : i32
    %c0_i32_0 = arith.constant 0 : i32
    %c0_i32_1 = arith.constant 0 : i32
    return %c0_i32, %c0_i32_0 : i32, i32
  }
  func.func @transform_4(%arg0: i32) -> (i32, i32) {
    %c0_i32 = arith.constant 0 : i32
    %c0_i32_0 = arith.constant 0 : i32
    %c0_i32_1 = arith.constant 0 : i32
    return %c0_i32, %c0_i32_0 : i32, i32
  }
  func.func @transform_5(%arg0: i32) -> (i32, i32) {
    %c0_i32 = arith.constant 0 : i32
    %c0_i32_0 = arith.constant 0 : i32
    %c0_i32_1 = arith.constant 0 : i32
    return %c0_i32, %c0_i32_0 : i32, i32
  }
  func.func @transform_6(%arg0: i32) -> (i32, i32) {
    %c0_i32 = arith.constant 0 : i32
    %c0_i32_0 = arith.constant 0 : i32
    %c0_i32_1 = arith.constant 0 : i32
    return %c0_i32, %c0_i32_0 : i32, i32
  }
  func.func @transform_7(%arg0: i32) -> (i32, i32) {
    %c0_i32 = arith.constant 0 : i32
    %c0_i32_0 = arith.constant 0 : i32
    return %arg0, %c0_i32 : i32, i32
  }
}

module attributes {stable_mosaic.version = 11 : i64} {
  func.func @_mlp_kernel(%arg0: i32, %arg1: memref<8x128xf32, #tpu.memory_space<vmem>>, %arg2: memref<128x128xf32, #tpu.memory_space<vmem>>, %arg3: memref<1x128xf32, #tpu.memory_space<vmem>>, %arg4: memref<128x128xf32, #tpu.memory_space<vmem>>, %arg5: memref<1x128xf32, #tpu.memory_space<vmem>>, %arg6: memref<128x128xf32, #tpu.memory_space<vmem>>, %arg7: memref<1x128xf32, #tpu.memory_space<vmem>>, %arg8: memref<8x128xf32, #tpu.memory_space<vmem>>) attributes {dimension_semantics = [#tpu.dimension_semantics<parallel>], iteration_bounds = array<i64: 2>, scalar_prefetch = 0 : i64, scratch_operands = 0 : i64, tpu.core_type = #tpu.core_type<tc>, window_params = [{transform_indices = @transform_0, window_bounds = array<i64: 8, 128>}, {pipeline_mode = #tpu.pipeline_mode<synchronous>, transform_indices = @transform_1, window_bounds = array<i64: 128, 128>}, {pipeline_mode = #tpu.pipeline_mode<synchronous>, transform_indices = @transform_2, window_bounds = array<i64: 1, 128>}, {pipeline_mode = #tpu.pipeline_mode<synchronous>, transform_indices = @transform_3, window_bounds = array<i64: 128, 128>}, {pipeline_mode = #tpu.pipeline_mode<synchronous>, transform_indices = @transform_4, window_bounds = array<i64: 1, 128>}, {pipeline_mode = #tpu.pipeline_mode<synchronous>, transform_indices = @transform_5, window_bounds = array<i64: 128, 128>}, {pipeline_mode = #tpu.pipeline_mode<synchronous>, transform_indices = @transform_6, window_bounds = array<i64: 1, 128>}, {transform_indices = @transform_7, window_bounds = array<i64: 8, 128>}]} {
    %c0 = arith.constant 0 : index
    %c0_0 = arith.constant 0 : index
    %0 = vector.load %arg1[%c0, %c0_0] : memref<8x128xf32, #tpu.memory_space<vmem>>, vector<8x128xf32>
    %c0_1 = arith.constant 0 : index
    %c0_2 = arith.constant 0 : index
    %1 = vector.load %arg2[%c0_1, %c0_2] : memref<128x128xf32, #tpu.memory_space<vmem>>, vector<128x128xf32>
    %c0_3 = arith.constant 0 : index
    %c0_4 = arith.constant 0 : index
    %2 = vector.load %arg3[%c0_3, %c0_4] : memref<1x128xf32, #tpu.memory_space<vmem>>, vector<1x128xf32>
    %cst = arith.constant dense<0.000000e+00> : vector<8x128xf32>
    %3 = tpu.matmul %0, %1, %cst {dimension_numbers = #tpu.dot_dimension_numbers<[1], [0], [0], [1], [0, 0, 1, 1], [], []>} : vector<8x128xf32>, vector<128x128xf32>, vector<8x128xf32> -> vector<8x128xf32>
    %4 = vector.broadcast %2 : vector<1x128xf32> to vector<8x128xf32>
    %5 = arith.addf %3, %4 : vector<8x128xf32>
    %cst_5 = arith.constant 0.000000e+00 : f32
    %6 = vector.broadcast %cst_5 : f32 to vector<8x128xf32>
    %7 = arith.maximumf %5, %6 : vector<8x128xf32>
    %c0_6 = arith.constant 0 : index
    %c0_7 = arith.constant 0 : index
    %8 = vector.load %arg4[%c0_6, %c0_7] : memref<128x128xf32, #tpu.memory_space<vmem>>, vector<128x128xf32>
    %c0_8 = arith.constant 0 : index
    %c0_9 = arith.constant 0 : index
    %9 = vector.load %arg5[%c0_8, %c0_9] : memref<1x128xf32, #tpu.memory_space<vmem>>, vector<1x128xf32>
    %cst_10 = arith.constant dense<0.000000e+00> : vector<8x128xf32>
    %10 = tpu.matmul %7, %8, %cst_10 {dimension_numbers = #tpu.dot_dimension_numbers<[1], [0], [0], [1], [0, 0, 1, 1], [], []>} : vector<8x128xf32>, vector<128x128xf32>, vector<8x128xf32> -> vector<8x128xf32>
    %11 = vector.broadcast %9 : vector<1x128xf32> to vector<8x128xf32>
    %12 = arith.addf %10, %11 : vector<8x128xf32>
    %cst_11 = arith.constant 0.000000e+00 : f32
    %13 = vector.broadcast %cst_11 : f32 to vector<8x128xf32>
    %14 = arith.maximumf %12, %13 : vector<8x128xf32>
    %c0_12 = arith.constant 0 : index
    %c0_13 = arith.constant 0 : index
    %15 = vector.load %arg6[%c0_12, %c0_13] : memref<128x128xf32, #tpu.memory_space<vmem>>, vector<128x128xf32>
    %c0_14 = arith.constant 0 : index
    %c0_15 = arith.constant 0 : index
    %16 = vector.load %arg7[%c0_14, %c0_15] : memref<1x128xf32, #tpu.memory_space<vmem>>, vector<1x128xf32>
    %cst_16 = arith.constant dense<0.000000e+00> : vector<8x128xf32>
    %17 = tpu.matmul %14, %15, %cst_16 {dimension_numbers = #tpu.dot_dimension_numbers<[1], [0], [0], [1], [0, 0, 1, 1], [], []>} : vector<8x128xf32>, vector<128x128xf32>, vector<8x128xf32> -> vector<8x128xf32>
    %18 = vector.broadcast %16 : vector<1x128xf32> to vector<8x128xf32>
    %19 = arith.addf %17, %18 : vector<8x128xf32>
    %c0_17 = arith.constant 0 : index
    %c0_18 = arith.constant 0 : index
    %20 = vector.load %arg8[%c0_17, %c0_18] : memref<8x128xf32, #tpu.memory_space<vmem>>, vector<8x128xf32>
    tpu.vector_store %arg8[%c0_17, %c0_18], %19 {strides = array<i32>} : memref<8x128xf32, #tpu.memory_space<vmem>>, vector<8x128xf32>,
    return
  }
  func.func @transform_0(%arg0: i32) -> (i32, i32) {
    %c0_i32 = arith.constant 0 : i32
    %c0_i32_0 = arith.constant 0 : i32
    return %arg0, %c0_i32 : i32, i32
  }
  func.func @transform_1(%arg0: i32) -> (i32, i32) {
    %c0_i32 = arith.constant 0 : i32
    %c0_i32_0 = arith.constant 0 : i32
    %c0_i32_1 = arith.constant 0 : i32
    return %c0_i32, %c0_i32_0 : i32, i32
  }
  func.func @transform_2(%arg0: i32) -> (i32, i32) {
    %c0_i32 = arith.constant 0 : i32
    %c0_i32_0 = arith.constant 0 : i32
    %c0_i32_1 = arith.constant 0 : i32
    return %c0_i32, %c0_i32_0 : i32, i32
  }
  func.func @transform_3(%arg0: i32) -> (i32, i32) {
    %c0_i32 = arith.constant 0 : i32
    %c0_i32_0 = arith.constant 0 : i32
    %c0_i32_1 = arith.constant 0 : i32
    return %c0_i32, %c0_i32_0 : i32, i32
  }
  func.func @transform_4(%arg0: i32) -> (i32, i32) {
    %c0_i32 = arith.constant 0 : i32
    %c0_i32_0 = arith.constant 0 : i32
    %c0_i32_1 = arith.constant 0 : i32
    return %c0_i32, %c0_i32_0 : i32, i32
  }
  func.func @transform_5(%arg0: i32) -> (i32, i32) {
    %c0_i32 = arith.constant 0 : i32
    %c0_i32_0 = arith.constant 0 : i32
    %c0_i32_1 = arith.constant 0 : i32
    return %c0_i32, %c0_i32_0 : i32, i32
  }
  func.func @transform_6(%arg0: i32) -> (i32, i32) {
    %c0_i32 = arith.constant 0 : i32
    %c0_i32_0 = arith.constant 0 : i32
    %c0_i32_1 = arith.constant 0 : i32
    return %c0_i32, %c0_i32_0 : i32, i32
  }
  func.func @transform_7(%arg0: i32) -> (i32, i32) {
    %c0_i32 = arith.constant 0 : i32
    %c0_i32_0 = arith.constant 0 : i32
    return %arg0, %c0_i32 : i32, i32
  }
}

</mosaic_0001>

<bundles_post_ra>
// kernel: tpu_custom_call.1
= control target key start
LH: loop header
LB: loop body
LE: loop exit
PB: predicated region body
PF: predicated region fallthrough
CT: control target
= control target key end

     0   :  { %12 = vsyncpa [#allocation3], 0  ;;  %s1863_s0 = inlined_call_operand.hbm [shape: f32[16,128], index: 0, kind: input, shape index: {}]   ;;  %s1864_s1 = inlined_call_operand.hbm [shape: f32[128,128], index: 1, kind: input, shape index: {}]   ;;  %s1865_s2 = inlined_call_operand.hbm [shape: f32[1,128], index: 2, kind: input, shape index: {}]   ;;  %s1866_s3 = inlined_call_operand.hbm [shape: f32[128,128], index: 3, kind: input, shape index: {}]   ;;  %s1867_s4 = inlined_call_operand.hbm [shape: f32[1,128], index: 4, kind: input, shape index: {}]   ;;  %s1868_s5 = inlined_call_operand.hbm [shape: f32[128,128], index: 5, kind: input, shape index: {}]   ;;  %s1869_s6 = inlined_call_operand.hbm [shape: f32[1,128], index: 6, kind: input, shape index: {}]   ;;  %s1870_s7 = inlined_call_operand.hbm [shape: f32[16,128], index: 7, kind: output, shape index: {}]  }
   0x1   :  { %14 = vsyncpa [#allocation3 + $0x1], 0 }
   0x2   :  { %15 = vsyncpa [#allocation6], 0 }
   0x3   :  { %16 = vsyncpa [#allocation9], 0 }
   0x4   :  { %17 = vsyncpa [#allocation12], 0 }
   0x5   :  { %18 = vsyncpa [#allocation4], 0 }
   0x6   :  { %20 = vsyncpa [#allocation4 + $0x1], 0  ;;  %s1497_s24 = smov 0   ;;  %s1499_s25 = smov 0  }
   0x7   :  { %s1501_s26 = smov 0   ;;  %s1503_s27 = smov 0  }
   0x8 LB: > { %s1444_s28 = smov [#allocation5]   ;;  %s1518_s30 = sadd.s32 4294967295, %s1442_s27   ;;  %s1442_s27 = sphi %s1503_s27, %s1896_s27   ;;  %s1438_s26 = sphi %s1501_s26, %s1895_s26   ;;  %s1434_s25 = sphi %s1499_s25, %s1894_s25   ;;  %s1430_s24 = sphi %s1497_s24, %s1893_s24  }
   0x9   : > { %s221_s29 = sshll.u32 %s1444_s28, 4  ;;  %p800_p0 = scmp.ge.s32.totalorder %s1442_s27, 1  ;;  %s1523_s29 = int_to_ptr.vmem [resolvable:$true] %s221_s29 }
   0xa   : > { %p1871_p1 = scmp.eq.s32.totalorder %s1518_s30, 0  ;;  %p209_p2 = scmp.lt.s32.totalorder %s1442_s27, 3 }
   0xb   : > { %s1445_s9 = smov [#allocation8]   ;;  %s1446_s12 = smov [#allocation11]  }
   0xc   : > { %p1525_p3 = pnand %p800_p0, %p209_p2  ;;  %s245_s10 = sshll.u32 %s1445_s9, 4  ;;  %s1538_s10 = int_to_ptr.vmem [resolvable:$true] %s245_s10 }
   0xd   : > { %s269_s13 = sshll.u32 %s1446_s12, 4  ;;  %s1166_s16 = scalar_lea.hbm %s1864_s1, 2048  ;;  %s1540_s13 = int_to_ptr.vmem [resolvable:$true] %s269_s13 }
   0xe   : > { %s1874_s8 = scalar_select %p1525_p3, 1, 0 }
   0xf   : > { %p1082_p5 = pneg %p1525_p3  ;;  %p1167_p7 = scmp.ne.s32.totalorder %s1864_s1, %s1166_s16 }
  0x10   : > { %p1173_p11 = scmp.lt.u32.totalorder %s1166_s16, %s1864_s1 }
  0x11   : > { %p1534_p6 = pnand %p1082_p5, %p1871_p1 }
  0x13   : > { %p1550_p8 = pneg %p1534_p6 }
  0x15   : > { %p1169_p9 = pnand %p1550_p8, %p1167_p7 }
  0x17   : > { %p1170_p10 = pneg %p1169_p9 }
  0x19   : > { %p1175_p12 = pnand %p1173_p11, %p1170_p10 }
  0x1b   : > { %1178 = shalt.err (!%p1175_p12)
}
  0x1c   : > { %s1179_s22 = scalar_lea.vmem %s1523_s29, 2048  ;;  %p1187_p5 = scmp.lt.s32.totalorder %s1523_s29, %s1523_s29 }
  0x1d   : > { %p1180_p13 = scmp.ne.s32.totalorder %s1523_s29, %s1179_s22  ;;  %p1188_p4 = scmp.lt.s32.totalorder %s1179_s22, %s1179_s22 }
  0x1f   : > { %p1182_p0 = pnand %p1180_p13, %p1550_p8  ;;  %p1189_p7 = por %p1188_p4, %p1187_p5 }
  0x21   : > { %p1183_p2 = pneg %p1182_p0 }
  0x23   : > { %p1190_p9 = pnand %p1189_p7, %p1183_p2 }
  0x25   : > { %1193 = shalt.err (!%p1190_p9)
}
  0x26   : > { %s1447_s23 = smov 128   ;;  %s1448_s28 = smov 8  }
  0x27   : > { %1085 = dma.hbm_to_vmem [thread:$0]  (!%p1534_p6), %s1864_s1, 2048, %s1523_s29, [#allocation6], %s1447_s23, %s1447_s23, %s1448_s28  }
  0x28   : > { %s1194_s16 = scalar_lea.hbm %s1866_s3, 2048 }
  0x29   : > { %p1195_p4 = scmp.ne.s32.totalorder %s1866_s3, %s1194_s16  ;;  %p1201_p12 = scmp.lt.u32.totalorder %s1194_s16, %s1866_s3 }
  0x2b   : > { %p1197_p10 = pnand %p1195_p4, %p1550_p8 }
  0x2d   : > { %p1198_p11 = pneg %p1197_p10 }
  0x2f   : > { %p1203_p13 = pnand %p1201_p12, %p1198_p11 }
  0x31   : > { %1206 = shalt.err (!%p1203_p13)
}
  0x32   : > { %s1207_s29 = scalar_lea.vmem %s1538_s10, 2048  ;;  %p1215_p7 = scmp.lt.s32.totalorder %s1538_s10, %s1538_s10 }
  0x33   : > { %p1208_p0 = scmp.ne.s32.totalorder %s1538_s10, %s1207_s29  ;;  %p1216_p9 = scmp.lt.s32.totalorder %s1207_s29, %s1207_s29 }
  0x35   : > { %p1210_p2 = pnand %p1208_p0, %p1550_p8  ;;  %p1217_p4 = por %p1216_p9, %p1215_p7 }
  0x37   : > { %p1211_p5 = pneg %p1210_p2 }
  0x39   : > { %p1218_p10 = pnand %p1217_p4, %p1211_p5 }
  0x3b   : > { %1221 = shalt.err (!%p1218_p10)
}
  0x3c   : > { %1091 = dma.hbm_to_vmem [thread:$0]  (!%p1534_p6), %s1866_s3, 2048, %s1538_s10, [#allocation9], %s1447_s23, %s1447_s23, %s1448_s28  }
  0x3d   : > { %s1222_s15 = scalar_lea.hbm %s1868_s5, 2048 }
  0x3e   : > { %p1223_p11 = scmp.ne.s32.totalorder %s1868_s5, %s1222_s15  ;;  %p1229_p0 = scmp.lt.u32.totalorder %s1222_s15, %s1868_s5 }
  0x40   : > { %p1225_p12 = pnand %p1223_p11, %p1550_p8 }
  0x42   : > { %p1226_p13 = pneg %p1225_p12 }
  0x44   : > { %p1231_p2 = pnand %p1229_p0, %p1226_p13 }
  0x46   : > { %1234 = shalt.err (!%p1231_p2)
}
  0x47   : > { %s1235_s10 = scalar_lea.vmem %s1540_s13, 2048  ;;  %p1243_p4 = scmp.lt.s32.totalorder %s1540_s13, %s1540_s13 }
  0x48   : > { %p1236_p5 = scmp.ne.s32.totalorder %s1540_s13, %s1235_s10  ;;  %p1244_p10 = scmp.lt.s32.totalorder %s1235_s10, %s1235_s10 }
  0x4a   : > { %p1238_p7 = pnand %p1236_p5, %p1550_p8  ;;  %p1245_p11 = por %p1244_p10, %p1243_p4 }
  0x4c   : > { %p1239_p9 = pneg %p1238_p7 }
  0x4e   : > { %p1246_p12 = pnand %p1245_p11, %p1239_p9 }
  0x50   : > { %1249 = shalt.err (!%p1246_p12)
}
  0x51   : > { %1097 = dma.hbm_to_vmem [thread:$0]  (!%p1534_p6), %s1868_s5, 2048, %s1540_s13, [#allocation12], %s1447_s23, %s1447_s23, %s1448_s28  }
  0x52   : > { %s1449_s22 = smov [#allocation7]   ;;  %s1450_s12 = smov [#allocation10]  }
  0x53   : > { %s235_s9 = sshll.u32 %s1449_s22, 4  ;;  %s259_s14 = sshll.u32 %s1450_s12, 4  ;;  %s236_s9 = int_to_ptr.vmem [resolvable:$true] %s235_s9  ;;  %s260_s14 = int_to_ptr.vmem [resolvable:$true] %s259_s14 }
  0x54   : > { %s1250_s17 = scalar_lea.hbm %s1865_s2, 16 }
  0x55   : > { %p1251_p13 = scmp.ne.s32.totalorder %s1865_s2, %s1250_s17  ;;  %p1257_p5 = scmp.lt.u32.totalorder %s1250_s17, %s1865_s2 }
  0x57   : > { %p1253_p0 = pnand %p1251_p13, %p1550_p8 }
  0x59   : > { %p1254_p2 = pneg %p1253_p0 }
  0x5b   : > { %p1259_p7 = pnand %p1257_p5, %p1254_p2 }
  0x5d   : > { %1262 = shalt.err (!%p1259_p7)
}
  0x5e   : > { %s1263_s13 = scalar_lea.vmem %s236_s9, 16  ;;  %s1270_s23 = scalar_lea.vmem %s236_s9, 32 }
  0x5f   : > { %p1264_p9 = scmp.ne.s32.totalorder %s236_s9, %s1263_s13  ;;  %p1271_p11 = scmp.lt.s32.totalorder %s236_s9, %s236_s9 }
  0x60   : > { %p1272_p12 = scmp.lt.s32.totalorder %s1270_s23, %s1263_s13 }
  0x61   : > { %p1266_p4 = pnand %p1264_p9, %p1550_p8 }
  0x62   : > { %p1273_p1 = por %p1272_p12, %p1271_p11 }
  0x63   : > { %p1267_p10 = pneg %p1266_p4 }
  0x65   : > { %p1274_p3 = pnand %p1273_p1, %p1267_p10 }
  0x67   : > { %1277 = shalt.err (!%p1274_p3)
}
  0x68   : > { %1088 = dma.hbm_to_vmem [thread:$0]  (!%p1534_p6), %s1865_s2, 16, %s236_s9, [#allocation6]  }
  0x69   : > { %s1278_s15 = scalar_lea.hbm %s1867_s4, 16 }
  0x6a   : > { %p1279_p13 = scmp.ne.s32.totalorder %s1867_s4, %s1278_s15  ;;  %p1285_p3 = scmp.lt.u32.totalorder %s1278_s15, %s1867_s4 }
  0x6c   : > { %p1281_p0 = pnand %p1279_p13, %p1550_p8 }
  0x6e   : > { %p1282_p1 = pneg %p1281_p0 }
  0x70   : > { %p1287_p2 = pnand %p1285_p3, %p1282_p1 }
  0x72   : > { %1290 = shalt.err (!%p1287_p2)
}
  0x73   : > { %s1291_s10 = scalar_lea.vmem %s260_s14, 16  ;;  %s1298_s9 = scalar_lea.vmem %s260_s14, 32 }
  0x74   : > { %p1292_p5 = scmp.ne.s32.totalorder %s260_s14, %s1291_s10  ;;  %p1299_p4 = scmp.lt.s32.totalorder %s260_s14, %s260_s14 }
  0x75   : > { %p1300_p10 = scmp.lt.s32.totalorder %s1298_s9, %s1291_s10 }
  0x76   : > { %p1294_p7 = pnand %p1292_p5, %p1550_p8 }
  0x77   : > { %p1301_p11 = por %p1300_p10, %p1299_p4 }
  0x78   : > { %p1295_p9 = pneg %p1294_p7 }
  0x7a   : > { %p1302_p12 = pnand %p1301_p11, %p1295_p9 }
  0x7c   : > { %1305 = shalt.err (!%p1302_p12)
}
  0x7d   : > { %1094 = dma.hbm_to_vmem [thread:$0]  (!%p1534_p6), %s1867_s4, 16, %s260_s14, [#allocation9]  }
  0x7e   : > { %s1451_s23 = smov [#allocation13]   ;;  %s1306_s12 = scalar_lea.hbm %s1869_s6, 16 }
  0x7f   : > { %s283_s28 = sshll.u32 %s1451_s23, 4  ;;  %p1307_p13 = scmp.ne.s32.totalorder %s1869_s6, %s1306_s12  ;;  %s284_s28 = int_to_ptr.vmem [resolvable:$true] %s283_s28 }
  0x80   : > { %p1313_p3 = scmp.lt.u32.totalorder %s1306_s12, %s1869_s6 }
  0x81   : > { %p1309_p0 = pnand %p1307_p13, %p1550_p8 }
  0x83   : > { %p1310_p1 = pneg %p1309_p0 }
  0x85   : > { %p1315_p2 = pnand %p1313_p3, %p1310_p1 }
  0x87   : > { %1318 = shalt.err (!%p1315_p2)
}
  0x88   : > { %s1319_s14 = scalar_lea.vmem %s284_s28, 16  ;;  %s1326_s20 = scalar_lea.vmem %s284_s28, 32 }
  0x89   : > { %p1320_p5 = scmp.ne.s32.totalorder %s284_s28, %s1319_s14  ;;  %p1327_p4 = scmp.lt.s32.totalorder %s284_s28, %s284_s28 }
  0x8a   : > { %p1328_p10 = scmp.lt.s32.totalorder %s1326_s20, %s1319_s14 }
  0x8b   : > { %p1322_p7 = pnand %p1320_p5, %p1550_p8 }
  0x8c   : > { %p1329_p11 = por %p1328_p10, %p1327_p4 }
  0x8d   : > { %p1323_p9 = pneg %p1322_p7 }
  0x8f   : > { %p1330_p12 = pnand %p1329_p11, %p1323_p9 }
  0x91   : > { %1333 = shalt.err (!%p1330_p12)
}
  0x92   : > { %1100 = dma.hbm_to_vmem [thread:$0]  (!%p1534_p6), %s1869_s6, 16, %s284_s28, [#allocation12]  }
  0x93   : > { %s799_s19 = sadd.s32 4294967294, %s1442_s27   ;;  %s1682_s11 = sadd.s32 1, %s1442_s27  }
  0x94   : > { %s30_s21 = ssub.s32 %s1442_s27, %s1682_s11  ;;  %s33_s13 = sadd.s32 1, %s1438_s26 }
  0x95   : > { %p31_p8 = scmp.eq.s32.totalorder %s30_s21, 0  ;;  %p40_p13 = scmp.ne.s32.totalorder %s1438_s26, %s1434_s25 }
  0x96   : > { %p41_p0 = scmp.eq.s32.totalorder %s1442_s27, 0  ;;  %p46_p1 = scmp.ne.s32.totalorder %s1434_s25, %s1430_s24 }
  0x97   : > { %s1693_s23 = scalar_select %p31_p8, %s1438_s26, %s33_s13  }
  0x98   : > { %p1695_p3 = por %p41_p0, %p40_p13  ;;  %p1878_p2 = scmp.eq.s32.totalorder %s1518_s30, 0 }
  0x99   : > { %p196_p5 = scmp.eq.s32.totalorder %s1518_s30, 1  ;;  %p202_p7 = scmp.eq.s32.totalorder %s799_s19, 1 }
  0x9a   : > { %p1701_p6 = por %p1878_p2, %p46_p1  ;;  %p1115_p9 = scmp.lt.s32.totalorder %s1442_s27, 2 }
  0x9b   : > { %s294_s22 = sand.u32 1, %s1438_s26   ;;  %p1708_p4 = por %p196_p5, %p40_p13 }
  0x9c   : > { %p1712_p10 = por %p202_p7, %p46_p1  ;;  %s808_s16 = sshll.u32 %s294_s22, 3 }
  0x9d   : > { %s1880_s12 = scalar_select %p1708_p4, 1, 0 }
  0x9e   : > { %s1881_s15 = scalar_select %p1712_p10, 1, 0 }
  0x9f   : > { %s809_s17 = sshll.u32 %s1442_s27, 7  ;;  %s298_s10 = scalar_lea.vmem [#allocation2], %s808_s16 }
  0xa0   : > { %s1720_s20 = scalar_lea.hbm %s1863_s0, %s809_s17  ;;  %s305_s9 = sshll.u32 %s298_s10, 4  ;;  %s1722_s9 = int_to_ptr.vmem [resolvable:$true] %s305_s9 }
  0xa1   : > { %p1726_p11 = pnand %p1115_p9, %p1695_p3  ;;  %s295_s21 = scalar_lea.sflag [#allocation3], %s294_s22 }
  0xa2   : > { %s1334_s13 = scalar_lea.hbm %s1720_s20, 128  ;;  %s1339_s18 = scalar_lea.hbm %s1863_s0, 256 }
  0xa3   : > { %p1335_p12 = scmp.ne.s32.totalorder %s1720_s20, %s1334_s13  ;;  %p1336_p8 = pneg %p1726_p11 }
  0xa4   : > { %p1340_p1 = scmp.lt.u32.totalorder %s1720_s20, %s1863_s0  ;;  %p1341_p3 = scmp.lt.u32.totalorder %s1339_s18, %s1334_s13 }
  0xa5   : > { %p1337_p13 = pnand %p1336_p8, %p1335_p12  ;;  %p1343_p5 = scmp.lt.u32.totalorder %s1334_s13, %s1720_s20 }
  0xa6   : > { %p1342_p2 = por %p1341_p3, %p1340_p1 }
  0xa7   : > { %p1338_p0 = pneg %p1337_p13 }
  0xa8   : > { %p1344_p7 = por %p1343_p5, %p1342_p2 }
  0xaa   : > { %p1345_p9 = pnand %p1344_p7, %p1338_p0 }
  0xac   : > { %1348 = shalt.err (!%p1345_p9)
}
  0xad   : > { %s1349_s22 = scalar_lea.vmem %s1722_s9, 128  ;;  %s1452_s10 = smov [#allocation2]  }
  0xae   : > { %p1350_p12 = scmp.ne.s32.totalorder %s1722_s9, %s1349_s22  ;;  %s1354_s16 = sshll.u32 %s1452_s10, 4  ;;  %s1355_s16 = int_to_ptr.vmem [resolvable:$false] %s1354_s16 }
  0xaf   : > { %s1356_s17 = scalar_lea.vmem %s1355_s16, 256  ;;  %p1357_p4 = scmp.lt.s32.totalorder %s1722_s9, %s1355_s16 }
  0xb0   : > { %p1352_p13 = pnand %p1350_p12, %p1336_p8  ;;  %p1358_p1 = scmp.lt.s32.totalorder %s1356_s17, %s1349_s22 }
  0xb2   : > { %p1353_p10 = pneg %p1352_p13  ;;  %p1359_p3 = por %p1358_p1, %p1357_p4 }
  0xb4   : > { %p1360_p2 = pnand %p1359_p3, %p1353_p10 }
  0xb6   : > { %1363 = shalt.err (!%p1360_p2)
}
  0xb7   : > { %1104 = dma.hbm_to_vmem [thread:$0]  (!%p1726_p11), %s1720_s20, 128, %s1722_s9, %s295_s21  }
  0xb8   : > { %p1883_p0 = scmp.ne.s32.totalorder %s1874_s8, 0 }
  0xb9   : > { %s1758_s13 = sand.u32 (!%p1883_p0), 1, %s1434_s25  }
  0xba   : > { %314 = sbr.rel (%p1883_p0) target bundleno = 897 (0x381), region = 48  ;;  %s811_s18 = sshll.u32 (!%p1883_p0), %s1758_s13, 3 }
  0xbb   : > { %s317_s29 = scalar_lea.sflag (!%p1883_p0), [#allocation3], %s1758_s13  ;;  %s1764_s14 = scalar_lea.vmem (!%p1883_p0), [#allocation2], %s811_s18 }
  0xc1   : > { %1409 = dma.done.wait (%p1701_p6), %s317_s29, 128  }
  0xc2   : > { %1411 = vsyncadd (%p1701_p6), %s317_s29, 4294967168  ;;  %p1884_p4 = scmp.eq.s32.totalorder %s1518_s30, 0 }
  0xc4   : > { %1413 = dma.done.wait (%p1884_p4), [#allocation6], 2064   ;;  %p1885_p10 = pmov %p1884_p4 }
  0xc5   : > { %p1886_p11 = pmov %p1884_p4 }
  0xc6   : > { %1415 = vsyncadd (%p1885_p10), [#allocation6], 4294965232 }
  0xc7   : > { %1417 = dma.done.wait (%p1886_p11), [#allocation9], 2064   ;;  %p1887_p8 = pmov %p1884_p4 }
  0xc8   : > { %p1888_p5 = pmov %p1884_p4 }
  0xc9   : > { %1419 = vsyncadd (%p1887_p8), [#allocation9], 4294965232 }
  0xca   : > { %1421 = dma.done.wait (%p1888_p5), [#allocation12], 2064   ;;  %p1889_p7 = pmov %p1884_p4 }
  0xcb   : > { %v1453_v0 = vmov 0.0|0.0   ;;  %vm1454_vm0 = vmmov 0   ;;  %v1455_v1 = vmov 0.0   ;;  %v376_v2 = vld [vmem:[#allocation5] sm:$0xff]  ;;  %v377_v3 = vld [vmem:[#allocation5 + $0x8] sm:$0xff]  ;;  %v378_v4 = vld [vmem:[#allocation5 + $0x10] sm:$0xff] }
  0xcc   : > { %1423 = vsyncadd (%p1889_p7), [#allocation12], 4294965232  ;;  %982 = vmatprep.subr.bf16.mxu0 %v1453_v0  ;;  %909 = vmatprep.mubr.msk.f32.mxu0 %vm1454_vm0, %v1455_v1  ;;  %v983_v5 = vpack.c.bf16 %v377_v3, %v376_v2  ;;  %v379_v6 = vld [vmem:[#allocation5 + $0x18] sm:$0xff]  ;;  %v380_v8 = vld [vmem:[#allocation5 + $0x20] sm:$0xff]  ;;  %s823_s8 = sshll.u32 %s1518_s30, 7  ;;  %s374_s28 = scalar_lea.vmem [#allocation14], %s811_s18 }
  0xcd   : > { %1006 = vmatprep.subr.bf16.mxu1 %v1453_v0  ;;  %944 = vmatprep.mubr.msk.f32.mxu1 %vm1454_vm0, %v1455_v1  ;;  %v986_v7 = vpack.c.bf16 %v379_v6, %v378_v4  ;;  %v381_v9 = vld [vmem:[#allocation5 + $0x28] sm:$0xff]  ;;  %v472_v12 = vld [vmem:[#allocation8 + $0x10] sm:$0xff]  ;;  %v473_v13 = vld [vmem:[#allocation8 + $0x18] sm:$0xff]  ;;  %s672_s20 = sshll.u32 %s374_s28, 4  ;;  %s1819_s21 = scalar_lea.hbm %s1870_s7, %s823_s8  ;;  %s1821_s20 = int_to_ptr.vmem [resolvable:$true] %s672_s20 }
  0xce   : > { %984 = vmatpush3.bf16.msra.mxu0 %v983_v5  ;;  %v470_v10 = vld [vmem:[#allocation8] sm:$0xff]  ;;  %v471_v11 = vld [vmem:[#allocation8 + $0x8] sm:$0xff]  ;;  %v989_v14 = vpack.c.bf16 %v381_v9, %v380_v8  ;;  %v383_v17 = vld [vmem:[#allocation5 + $0x38] sm:$0xff]  ;;  %v1010_v18 = vpack.c.bf16 %v473_v13, %v472_v12  ;;  %s659_s22 = scalar_lea.sflag [#allocation4], %s1758_s13  ;;  %s1364_s10 = scalar_lea.vmem %s1821_s20, 128 }
  0xcf   : > { %985 = vmatprep.subr.bf16.mxu0 %v1453_v0  ;;  %v1007_v15 = vpack.c.bf16 %v471_v11, %v470_v10  ;;  %v382_v16 = vld [vmem:[#allocation5 + $0x30] sm:$0xff]  ;;  %v474_v19 = vld [vmem:[#allocation8 + $0x20] sm:$0xff]  ;;  %v477_v26 = vld [vmem:[#allocation8 + $0x38] sm:$0xff]  ;;  %p1365_p6 = scmp.ne.s32.totalorder %s1821_s20, %s1364_s10  ;;  %p1890_p9 = scmp.ne.s32.totalorder %s1880_s12, 0 }
  0xd0   : > { %v475_v20 = vld [vmem:[#allocation8 + $0x28] sm:$0xff]  ;;  %v992_v21 = vpack.c.bf16 %v383_v17, %v382_v16  ;;  %v384_v22 = vld [vmem:[#allocation5 + $0x40] sm:$0xff]  ;;  %v476_v25 = vld [vmem:[#allocation8 + $0x30] sm:$0xff]  ;;  %s1456_s30 = smov [#allocation14]  }
  0xd1   : > { %1008 = vmatpush3.bf16.msra.mxu1 %v1007_v15  ;;  %v385_v23 = vld [vmem:[#allocation5 + $0x48] sm:$0xff]  ;;  %v1013_v24 = vpack.c.bf16 %v475_v20, %v474_v19  ;;  %v386_v28 = vld [vmem:[#allocation5 + $0x50] sm:$0xff]  ;;  %v387_v29 = vld [vmem:[#allocation5 + $0x58] sm:$0xff]  ;;  %v1016_v30 = vpack.c.bf16 %v477_v26, %v476_v25  ;;  %p1366_p12 = pnand %p1365_p6, %p1890_p9  ;;  %s1368_s16 = sshll.u32 %s1456_s30, 4  ;;  %s1369_s16 = int_to_ptr.vmem [resolvable:$false] %s1368_s16 }
  0xd2   : > { %987 = vmatpush3.bf16.msra.mxu0 %v986_v7  ;;  %1009 = vmatprep.subr.bf16.mxu1 %v1453_v0  ;;  %v995_v27 = vpack.c.bf16 %v385_v23, %v384_v22  ;;  %v478_v31 = vld [vmem:[#allocation8 + $0x40] sm:$0xff]  ;;  %v479_v32 = vld [vmem:[#allocation8 + $0x48] sm:$0xff]  ;;  %v998_v33 = vpack.c.bf16 %v387_v29, %v386_v28  ;;  %v480_v37 = vld [vmem:[#allocation8 + $0x50] sm:$0xff]  ;;  %s1370_s17 = scalar_lea.vmem %s1369_s16, 256  ;;  %p1371_p1 = scmp.lt.s32.totalorder %s1821_s20, %s1369_s16 }
  0xd3   : > { %988 = vmatprep.subr.bf16.mxu0 %v1453_v0  ;;  %v388_v34 = vld [vmem:[#allocation5 + $0x60] sm:$0xff]  ;;  %v389_v35 = vld [vmem:[#allocation5 + $0x68] sm:$0xff]  ;;  %v1019_v36 = vpack.c.bf16 %v479_v32, %v478_v31  ;;  %v390_v40 = vld [vmem:[#allocation5 + $0x70] sm:$0xff]  ;;  %p1367_p13 = pneg %p1366_p12  ;;  %p1372_p3 = scmp.lt.s32.totalorder %s1370_s17, %s1364_s10 }
  0xd4   : > { %v481_v38 = vld [vmem:[#allocation8 + $0x58] sm:$0xff]  ;;  %v1001_v39 = vpack.c.bf16 %v389_v35, %v388_v34  ;;  %v482_v43 = vld [vmem:[#allocation8 + $0x60] sm:$0xff]  ;;  %v483_v44 = vld [vmem:[#allocation8 + $0x68] sm:$0xff] }
  0xd5   : > { %1011 = vmatpush3.bf16.msra.mxu1 %v1010_v18  ;;  %v391_v41 = vld [vmem:[#allocation5 + $0x78] sm:$0xff]  ;;  %v1022_v42 = vpack.c.bf16 %v481_v38, %v480_v37  ;;  %v1025_v46 = vpack.c.bf16 %v483_v44, %v482_v43  ;;  %v564_v51 = vld [vmem:[#allocation11] sm:$0xff]  ;;  %v565_v52 = vld [vmem:[#allocation11 + $0x8] sm:$0xff]  ;;  %p1373_p2 = por %p1372_p3, %p1371_p1 }
  0xd6   : > { %990 = vmatpush3.bf16.msra.mxu0 %v989_v14  ;;  %1012 = vmatprep.subr.bf16.mxu1 %v1453_v0  ;;  %v1004_v45 = vpack.c.bf16 %v391_v41, %v390_v40  ;;  %v375_v47 = vld [vmem:[%s1764_s14] sm:$0xff]  ;;  %v1031_v54 = vpack.c.bf16 %v565_v52, %v564_v51  ;;  %v568_v57 = vld [vmem:[#allocation11 + $0x20] sm:$0xff]  ;;  %v819_v9 = vld [vmem:[#allocation7] ss:$0 sm:$0xff] }
  0xd7   : > { %991 = vmatprep.subr.bf16.mxu0 %v1453_v0  ;;  %v484_v48 = vld [vmem:[#allocation8 + $0x70] sm:$0xff]  ;;  %v485_v49 = vld [vmem:[#allocation8 + $0x78] sm:$0xff]  ;;  %v572_v63 = vld [vmem:[#allocation11 + $0x40] sm:$0xff]  ;;  %p1374_p0 = pnand %p1373_p2, %p1367_p13 }
  0xd8   : > { %v1028_v50 = vpack.c.bf16 %v485_v49, %v484_v48  ;;  %v566_v53 = vld [vmem:[#allocation11 + $0x10] sm:$0xff]  ;;  %v567_v55 = vld [vmem:[#allocation11 + $0x18] sm:$0xff]  ;;  %v569_v58 = vld [vmem:[#allocation11 + $0x28] sm:$0xff] }
  0xd9   : > { %1014 = vmatpush3.bf16.msra.mxu1 %v1013_v24  ;;  %v1034_v56 = vpack.c.bf16 %v567_v55, %v566_v53  ;;  %v1037_v59 = vpack.c.bf16 %v569_v58, %v568_v57  ;;  %v570_v60 = vld [vmem:[#allocation11 + $0x30] sm:$0xff]  ;;  %v571_v61 = vld [vmem:[#allocation11 + $0x38] sm:$0xff]  ;;  %v576_v6 = vld [vmem:[#allocation11 + $0x60] sm:$0xff] }
  0xda   : > { %993 = vmatpush3.bf16.msra.mxu0 %v992_v21  ;;  %1015 = vmatprep.subr.bf16.mxu1 %v1453_v0  ;;  %v1040_v62 = vpack.c.bf16 %v571_v61, %v570_v60  ;;  %v574_v3 = vld [vmem:[#allocation11 + $0x50] sm:$0xff]  ;;  %v575_v4 = vld [vmem:[#allocation11 + $0x58] sm:$0xff]  ;;  %v577_v7 = vld [vmem:[#allocation11 + $0x68] sm:$0xff] }
  0xdb   : > { %994 = vmatprep.subr.bf16.mxu0 %v1453_v0  ;;  %v1046_v5 = vpack.c.bf16 %v575_v4, %v574_v3  ;;  %v1049_v8 = vpack.c.bf16 %v577_v7, %v576_v6  ;;  %v578_v14 = vld [vmem:[#allocation11 + $0x70] sm:$0xff]  ;;  %v579_v15 = vld [vmem:[#allocation11 + $0x78] sm:$0xff] }
  0xdc   : > { %v1052_v16 = vpack.c.bf16 %v579_v15, %v578_v14  ;;  %v820_v17 = vld [vmem:[#allocation10] ss:$0 sm:$0xff] }
  0xdd   : > { %1017 = vmatpush3.bf16.msra.mxu1 %v1016_v30 }
  0xde   : > { %996 = vmatpush3.bf16.msra.mxu0 %v995_v27  ;;  %1018 = vmatprep.subr.bf16.mxu1 %v1453_v0 }
  0xdf   : > { %997 = vmatprep.subr.bf16.mxu0 %v1453_v0 }
  0xe1   : > { %1020 = vmatpush3.bf16.msra.mxu1 %v1019_v36 }
  0xe2   : > { %999 = vmatpush3.bf16.msra.mxu0 %v998_v33  ;;  %1021 = vmatprep.subr.bf16.mxu1 %v1453_v0 }
  0xe3   : > { %1000 = vmatprep.subr.bf16.mxu0 %v1453_v0 }
  0xe5   : > { %1023 = vmatpush3.bf16.msra.mxu1 %v1022_v42 }
  0xe6   : > { %1002 = vmatpush3.bf16.msra.mxu0 %v1001_v39  ;;  %1024 = vmatprep.subr.bf16.mxu1 %v1453_v0 }
  0xe7   : > { %1003 = vmatprep.subr.bf16.mxu0 %v1453_v0 }
  0xe9   : > { %1026 = vmatpush3.bf16.msra.mxu1 %v1025_v46 }
  0xea   : > { %1005 = vmatpush3.bf16.msra.mxu0 %v1004_v45  ;;  %1027 = vmatprep.subr.bf16.mxu1 %v1453_v0 }
  0xeb   : > { %1030 = vmatprep.subr.bf16.mxu0 %v1453_v0 }
  0xed   : > { %910 = vmatmul.mubr.f32.vlgmr.msra.gmra.mrb[0].mxu0 %v375_v47  ;;  %1029 = vmatpush3.bf16.msra.mxu1 %v1028_v50 }
  0xee   : > { %979 = vmatprep.mubr.msk.f32.mxu0 %vm1454_vm0, %v1455_v1  ;;  %1032 = vmatpush3.bf16.msra.mxu0 %v1031_v54  ;;  %v573_v1 = vld [vmem:[#allocation11 + $0x48] sm:$0xff] }
  0xef   : > { %1033 = vmatprep.subr.bf16.mxu0 %v1453_v0  ;;  %v1043_v2 = vpack.c.bf16 %v573_v1, %v572_v63 }
  0xf2   : > { %1035 = vmatpush3.bf16.msra.mxu0 %v1034_v56 }
  0xf3   : > { %1036 = vmatprep.subr.bf16.mxu0 %v1453_v0 }
  0xf6   : > { %1038 = vmatpush3.bf16.msra.mxu0 %v1037_v59 }
  0xf7   : > { %1039 = vmatprep.subr.bf16.mxu0 %v1453_v0 }
  0xfa   : > { %1041 = vmatpush3.bf16.msra.mxu0 %v1040_v62 }
  0xfb   : > { %1042 = vmatprep.subr.bf16.mxu0 %v1453_v0 }
  0xfe   : > { %1044 = vmatpush3.bf16.msra.mxu0 %v1043_v2 }
  0xff   : > { %1045 = vmatprep.subr.bf16.mxu0 %v1453_v0 }
 0x102   : > { %1047 = vmatpush3.bf16.msra.mxu0 %v1046_v5 }
 0x103   : > { %1048 = vmatprep.subr.bf16.mxu0 %v1453_v0 }
 0x106   : > { %1050 = vmatpush3.bf16.msra.mxu0 %v1049_v8 }
 0x107   : > { %1051 = vmatprep.subr.bf16.mxu0 %v1453_v0  ;;  %v821_v0 = vld [vmem:[#allocation13] ss:$0 sm:$0xff] }
 0x10a   : > { %1053 = vmatpush3.bf16.msra.mxu0 %v1052_v16 }
 0x1c0   : > { %v465_v10 = vpop.f32.mrb[0].mxu0 }
 0x1c1   : > { %v466_v11 = vadd.f32 %v819_v9, %v465_v10  ;;  %v911_v12 = vpop.f32.mrb[1].mxu0 }
 0x1c3   : > { %v469_v13 = vmax.f32 %v466_v11, 0.0 }
 0x1c5   : > { %945 = vmatmul.mubr.f32.vlgmr.msra.gmra.mrb[0].mxu1 %v469_v13 }
 0x298   : > { %v559_v18 = vpop.f32.mrb[0].mxu1 }
 0x299   : > { %v560_v19 = vadd.f32 %v820_v17, %v559_v18  ;;  %v946_v20 = vpop.f32.mrb[1].mxu1 }
 0x29b   : > { %v563_v21 = vmax.f32 %v560_v19, 0.0 }
 0x29d   : > { %980 = vmatmul.mubr.f32.vlgmr.msra.gmra.mrb[2].mxu0 %v563_v21 }
 0x370   : > { %v653_v22 = vpop.f32.mrb[2].mxu0 }
 0x371   : > { %v654_v23 = vadd.f32 %v821_v0, %v653_v22  ;;  %v981_v24 = vpop.f32.mrb[3].mxu0 }
 0x373   : > { %657 = vst [vmem:[%s374_s28] sm:$0xff] %v654_v23 }
 0x374   : > { %1377 = shalt.err (!%p1374_p0)
}
 0x375   : > { %s1378_s13 = scalar_lea.hbm %s1819_s21, 128  ;;  %s1382_s14 = scalar_lea.hbm %s1870_s7, 256 }
 0x376   : > { %p1379_p4 = scmp.ne.s32.totalorder %s1819_s21, %s1378_s13  ;;  %p1383_p8 = scmp.lt.u32.totalorder %s1819_s21, %s1870_s7 }
 0x377   : > { %p1384_p5 = scmp.lt.u32.totalorder %s1382_s14, %s1378_s13  ;;  %p1386_p6 = scmp.lt.u32.totalorder %s1378_s13, %s1819_s21 }
 0x378   : > { %p1380_p10 = pnand %p1379_p4, %p1890_p9 }
 0x379   : > { %p1385_p7 = por %p1384_p5, %p1383_p8 }
 0x37a   : > { %p1381_p11 = pneg %p1380_p10 }
 0x37b   : > { %p1387_p12 = por %p1386_p6, %p1385_p7 }
 0x37d   : > { %p1388_p13 = pnand %p1387_p12, %p1381_p11 }
 0x37f   : > { %1391 = shalt.err (!%p1388_p13)
}
 0x380   : > { %1080 = dma.vmem_to_hbm [thread:$0]  (%p1890_p9), %s1821_s20, 128, %s1819_s21, %s659_s22  }
 0x381 PF: > { %s684_s9 = sand.u32 1, %s1430_s24   ;;  %p1891_p1 = scmp.ne.s32.totalorder %s1881_s15, 0 }
 0x382   : > { %p1892_p3 = scmp.ge.s32.totalorder %s1442_s27, 2  ;;  %s685_s19 = scalar_lea.sflag [#allocation4], %s684_s9 }
 0x384   : > { %p1106_p2 = pnand %p1892_p3, %p1891_p1 }
 0x386   : > { %1425 = dma.done.wait (!%p1106_p2), %s685_s19, 128  }
 0x387   : > { %1427 = vsyncadd (!%p1106_p2), %s685_s19, 4294967168  ;;  %p23_p0 = scmp.ge.s32.totalorder %s1682_s11, 4   ;;  %s1893_s24 = smov %s1434_s25 }
 0x388   : > { %s1894_s25 = smov %s1438_s26  ;;  %s1895_s26 = smov %s1693_s23 }
 0x389   : > { %s1896_s27 = smov %s1682_s11  ;;  %25 = sbr.rel (!%p23_p0) target bundleno = 8 (0x8), region = 117 }
 0x390   :  { %690 = vsyncpa [#allocation3], 1 }
 0x391   :  { %692 = vsyncpa [#allocation3 + $0x1], 1 }
 0x392   :  { %693 = vsyncpa [#allocation6], 1 }
 0x393   :  { %694 = vsyncpa [#allocation9], 1 }
 0x394   :  { %695 = vsyncpa [#allocation12], 1 }
 0x395   :  { %696 = vsyncpa [#allocation4], 1 }
 0x396   :  { %698 = vsyncpa [#allocation4 + $0x1], 1 }

// kernel: tpu_custom_call.1
= control target key start
LH: loop header
LB: loop body
LE: loop exit
PB: predicated region body
PF: predicated region fallthrough
CT: control target
= control target key end

     0   :  { %12 = vsyncpa [#allocation3], 0  ;;  %s1863_s0 = inlined_call_operand.hbm [shape: f32[16,128], index: 0, kind: input, shape index: {}]   ;;  %s1864_s1 = inlined_call_operand.hbm [shape: f32[128,128], index: 1, kind: input, shape index: {}]   ;;  %s1865_s2 = inlined_call_operand.hbm [shape: f32[1,128], index: 2, kind: input, shape index: {}]   ;;  %s1866_s3 = inlined_call_operand.hbm [shape: f32[128,128], index: 3, kind: input, shape index: {}]   ;;  %s1867_s4 = inlined_call_operand.hbm [shape: f32[1,128], index: 4, kind: input, shape index: {}]   ;;  %s1868_s5 = inlined_call_operand.hbm [shape: f32[128,128], index: 5, kind: input, shape index: {}]   ;;  %s1869_s6 = inlined_call_operand.hbm [shape: f32[1,128], index: 6, kind: input, shape index: {}]   ;;  %s1870_s7 = inlined_call_operand.hbm [shape: f32[16,128], index: 7, kind: output, shape index: {}]  }
   0x1   :  { %14 = vsyncpa [#allocation3 + $0x1], 0 }
   0x2   :  { %15 = vsyncpa [#allocation6], 0 }
   0x3   :  { %16 = vsyncpa [#allocation9], 0 }
   0x4   :  { %17 = vsyncpa [#allocation12], 0 }
   0x5   :  { %18 = vsyncpa [#allocation4], 0 }
   0x6   :  { %20 = vsyncpa [#allocation4 + $0x1], 0  ;;  %s1497_s24 = smov 0   ;;  %s1499_s25 = smov 0  }
   0x7   :  { %s1501_s26 = smov 0   ;;  %s1503_s27 = smov 0  }
   0x8 LB: > { %s1444_s28 = smov [#allocation5]   ;;  %s1518_s30 = sadd.s32 4294967295, %s1442_s27   ;;  %s1442_s27 = sphi %s1503_s27, %s1896_s27   ;;  %s1438_s26 = sphi %s1501_s26, %s1895_s26   ;;  %s1434_s25 = sphi %s1499_s25, %s1894_s25   ;;  %s1430_s24 = sphi %s1497_s24, %s1893_s24  }
   0x9   : > { %s221_s29 = sshll.u32 %s1444_s28, 4  ;;  %p800_p0 = scmp.ge.s32.totalorder %s1442_s27, 1  ;;  %s1523_s29 = int_to_ptr.vmem [resolvable:$true] %s221_s29 }
   0xa   : > { %p1871_p1 = scmp.eq.s32.totalorder %s1518_s30, 0  ;;  %p209_p2 = scmp.lt.s32.totalorder %s1442_s27, 3 }
   0xb   : > { %s1445_s9 = smov [#allocation8]   ;;  %s1446_s12 = smov [#allocation11]  }
   0xc   : > { %p1525_p3 = pnand %p800_p0, %p209_p2  ;;  %s245_s10 = sshll.u32 %s1445_s9, 4  ;;  %s1538_s10 = int_to_ptr.vmem [resolvable:$true] %s245_s10 }
   0xd   : > { %s269_s13 = sshll.u32 %s1446_s12, 4  ;;  %s1166_s16 = scalar_lea.hbm %s1864_s1, 2048  ;;  %s1540_s13 = int_to_ptr.vmem [resolvable:$true] %s269_s13 }
   0xe   : > { %s1874_s8 = scalar_select %p1525_p3, 1, 0 }
   0xf   : > { %p1082_p5 = pneg %p1525_p3  ;;  %p1167_p7 = scmp.ne.s32.totalorder %s1864_s1, %s1166_s16 }
  0x10   : > { %p1173_p11 = scmp.lt.u32.totalorder %s1166_s16, %s1864_s1 }
  0x11   : > { %p1534_p6 = pnand %p1082_p5, %p1871_p1 }
  0x13   : > { %p1550_p8 = pneg %p1534_p6 }
  0x15   : > { %p1169_p9 = pnand %p1550_p8, %p1167_p7 }
  0x17   : > { %p1170_p10 = pneg %p1169_p9 }
  0x19   : > { %p1175_p12 = pnand %p1173_p11, %p1170_p10 }
  0x1b   : > { %1178 = shalt.err (!%p1175_p12)
}
  0x1c   : > { %s1179_s22 = scalar_lea.vmem %s1523_s29, 2048  ;;  %p1187_p5 = scmp.lt.s32.totalorder %s1523_s29, %s1523_s29 }
  0x1d   : > { %p1180_p13 = scmp.ne.s32.totalorder %s1523_s29, %s1179_s22  ;;  %p1188_p4 = scmp.lt.s32.totalorder %s1179_s22, %s1179_s22 }
  0x1f   : > { %p1182_p0 = pnand %p1180_p13, %p1550_p8  ;;  %p1189_p7 = por %p1188_p4, %p1187_p5 }
  0x21   : > { %p1183_p2 = pneg %p1182_p0 }
  0x23   : > { %p1190_p9 = pnand %p1189_p7, %p1183_p2 }
  0x25   : > { %1193 = shalt.err (!%p1190_p9)
}
  0x26   : > { %s1447_s23 = smov 128   ;;  %s1448_s28 = smov 8  }
  0x27   : > { %1085 = dma.hbm_to_vmem [thread:$0]  (!%p1534_p6), %s1864_s1, 2048, %s1523_s29, [#allocation6], %s1447_s23, %s1447_s23, %s1448_s28  }
  0x28   : > { %s1194_s16 = scalar_lea.hbm %s1866_s3, 2048 }
  0x29   : > { %p1195_p4 = scmp.ne.s32.totalorder %s1866_s3, %s1194_s16  ;;  %p1201_p12 = scmp.lt.u32.totalorder %s1194_s16, %s1866_s3 }
  0x2b   : > { %p1197_p10 = pnand %p1195_p4, %p1550_p8 }
  0x2d   : > { %p1198_p11 = pneg %p1197_p10 }
  0x2f   : > { %p1203_p13 = pnand %p1201_p12, %p1198_p11 }
  0x31   : > { %1206 = shalt.err (!%p1203_p13)
}
  0x32   : > { %s1207_s29 = scalar_lea.vmem %s1538_s10, 2048  ;;  %p1215_p7 = scmp.lt.s32.totalorder %s1538_s10, %s1538_s10 }
  0x33   : > { %p1208_p0 = scmp.ne.s32.totalorder %s1538_s10, %s1207_s29  ;;  %p1216_p9 = scmp.lt.s32.totalorder %s1207_s29, %s1207_s29 }
  0x35   : > { %p1210_p2 = pnand %p1208_p0, %p1550_p8  ;;  %p1217_p4 = por %p1216_p9, %p1215_p7 }
  0x37   : > { %p1211_p5 = pneg %p1210_p2 }
  0x39   : > { %p1218_p10 = pnand %p1217_p4, %p1211_p5 }
  0x3b   : > { %1221 = shalt.err (!%p1218_p10)
}
  0x3c   : > { %1091 = dma.hbm_to_vmem [thread:$0]  (!%p1534_p6), %s1866_s3, 2048, %s1538_s10, [#allocation9], %s1447_s23, %s1447_s23, %s1448_s28  }
  0x3d   : > { %s1222_s15 = scalar_lea.hbm %s1868_s5, 2048 }
  0x3e   : > { %p1223_p11 = scmp.ne.s32.totalorder %s1868_s5, %s1222_s15  ;;  %p1229_p0 = scmp.lt.u32.totalorder %s1222_s15, %s1868_s5 }
  0x40   : > { %p1225_p12 = pnand %p1223_p11, %p1550_p8 }
  0x42   : > { %p1226_p13 = pneg %p1225_p12 }
  0x44   : > { %p1231_p2 = pnand %p1229_p0, %p1226_p13 }
  0x46   : > { %1234 = shalt.err (!%p1231_p2)
}
  0x47   : > { %s1235_s10 = scalar_lea.vmem %s1540_s13, 2048  ;;  %p1243_p4 = scmp.lt.s32.totalorder %s1540_s13, %s1540_s13 }
  0x48   : > { %p1236_p5 = scmp.ne.s32.totalorder %s1540_s13, %s1235_s10  ;;  %p1244_p10 = scmp.lt.s32.totalorder %s1235_s10, %s1235_s10 }
  0x4a   : > { %p1238_p7 = pnand %p1236_p5, %p1550_p8  ;;  %p1245_p11 = por %p1244_p10, %p1243_p4 }
  0x4c   : > { %p1239_p9 = pneg %p1238_p7 }
  0x4e   : > { %p1246_p12 = pnand %p1245_p11, %p1239_p9 }
  0x50   : > { %1249 = shalt.err (!%p1246_p12)
}
  0x51   : > { %1097 = dma.hbm_to_vmem [thread:$0]  (!%p1534_p6), %s1868_s5, 2048, %s1540_s13, [#allocation12], %s1447_s23, %s1447_s23, %s1448_s28  }
  0x52   : > { %s1449_s22 = smov [#allocation7]   ;;  %s1450_s12 = smov [#allocation10]  }
  0x53   : > { %s235_s9 = sshll.u32 %s1449_s22, 4  ;;  %s259_s14 = sshll.u32 %s1450_s12, 4  ;;  %s236_s9 = int_to_ptr.vmem [resolvable:$true] %s235_s9  ;;  %s260_s14 = int_to_ptr.vmem [resolvable:$true] %s259_s14 }
  0x54   : > { %s1250_s17 = scalar_lea.hbm %s1865_s2, 16 }
  0x55   : > { %p1251_p13 = scmp.ne.s32.totalorder %s1865_s2, %s1250_s17  ;;  %p1257_p5 = scmp.lt.u32.totalorder %s1250_s17, %s1865_s2 }
  0x57   : > { %p1253_p0 = pnand %p1251_p13, %p1550_p8 }
  0x59   : > { %p1254_p2 = pneg %p1253_p0 }
  0x5b   : > { %p1259_p7 = pnand %p1257_p5, %p1254_p2 }
  0x5d   : > { %1262 = shalt.err (!%p1259_p7)
}
  0x5e   : > { %s1263_s13 = scalar_lea.vmem %s236_s9, 16  ;;  %s1270_s23 = scalar_lea.vmem %s236_s9, 32 }
  0x5f   : > { %p1264_p9 = scmp.ne.s32.totalorder %s236_s9, %s1263_s13  ;;  %p1271_p11 = scmp.lt.s32.totalorder %s236_s9, %s236_s9 }
  0x60   : > { %p1272_p12 = scmp.lt.s32.totalorder %s1270_s23, %s1263_s13 }
  0x61   : > { %p1266_p4 = pnand %p1264_p9, %p1550_p8 }
  0x62   : > { %p1273_p1 = por %p1272_p12, %p1271_p11 }
  0x63   : > { %p1267_p10 = pneg %p1266_p4 }
  0x65   : > { %p1274_p3 = pnand %p1273_p1, %p1267_p10 }
  0x67   : > { %1277 = shalt.err (!%p1274_p3)
}
  0x68   : > { %1088 = dma.hbm_to_vmem [thread:$0]  (!%p1534_p6), %s1865_s2, 16, %s236_s9, [#allocation6]  }
  0x69   : > { %s1278_s15 = scalar_lea.hbm %s1867_s4, 16 }
  0x6a   : > { %p1279_p13 = scmp.ne.s32.totalorder %s1867_s4, %s1278_s15  ;;  %p1285_p3 = scmp.lt.u32.totalorder %s1278_s15, %s1867_s4 }
  0x6c   : > { %p1281_p0 = pnand %p1279_p13, %p1550_p8 }
  0x6e   : > { %p1282_p1 = pneg %p1281_p0 }
  0x70   : > { %p1287_p2 = pnand %p1285_p3, %p1282_p1 }
  0x72   : > { %1290 = shalt.err (!%p1287_p2)
}
  0x73   : > { %s1291_s10 = scalar_lea.vmem %s260_s14, 16  ;;  %s1298_s9 = scalar_lea.vmem %s260_s14, 32 }
  0x74   : > { %p1292_p5 = scmp.ne.s32.totalorder %s260_s14, %s1291_s10  ;;  %p1299_p4 = scmp.lt.s32.totalorder %s260_s14, %s260_s14 }
  0x75   : > { %p1300_p10 = scmp.lt.s32.totalorder %s1298_s9, %s1291_s10 }
  0x76   : > { %p1294_p7 = pnand %p1292_p5, %p1550_p8 }
  0x77   : > { %p1301_p11 = por %p1300_p10, %p1299_p4 }
  0x78   : > { %p1295_p9 = pneg %p1294_p7 }
  0x7a   : > { %p1302_p12 = pnand %p1301_p11, %p1295_p9 }
  0x7c   : > { %1305 = shalt.err (!%p1302_p12)
}
  0x7d   : > { %1094 = dma.hbm_to_vmem [thread:$0]  (!%p1534_p6), %s1867_s4, 16, %s260_s14, [#allocation9]  }
  0x7e   : > { %s1451_s23 = smov [#allocation13]   ;;  %s1306_s12 = scalar_lea.hbm %s1869_s6, 16 }
  0x7f   : > { %s283_s28 = sshll.u32 %s1451_s23, 4  ;;  %p1307_p13 = scmp.ne.s32.totalorder %s1869_s6, %s1306_s12  ;;  %s284_s28 = int_to_ptr.vmem [resolvable:$true] %s283_s28 }
  0x80   : > { %p1313_p3 = scmp.lt.u32.totalorder %s1306_s12, %s1869_s6 }
  0x81   : > { %p1309_p0 = pnand %p1307_p13, %p1550_p8 }
  0x83   : > { %p1310_p1 = pneg %p1309_p0 }
  0x85   : > { %p1315_p2 = pnand %p1313_p3, %p1310_p1 }
  0x87   : > { %1318 = shalt.err (!%p1315_p2)
}
  0x88   : > { %s1319_s14 = scalar_lea.vmem %s284_s28, 16  ;;  %s1326_s20 = scalar_lea.vmem %s284_s28, 32 }
  0x89   : > { %p1320_p5 = scmp.ne.s32.totalorder %s284_s28, %s1319_s14  ;;  %p1327_p4 = scmp.lt.s32.totalorder %s284_s28, %s284_s28 }
  0x8a   : > { %p1328_p10 = scmp.lt.s32.totalorder %s1326_s20, %s1319_s14 }
  0x8b   : > { %p1322_p7 = pnand %p1320_p5, %p1550_p8 }
  0x8c   : > { %p1329_p11 = por %p1328_p10, %p1327_p4 }
  0x8d   : > { %p1323_p9 = pneg %p1322_p7 }
  0x8f   : > { %p1330_p12 = pnand %p1329_p11, %p1323_p9 }
  0x91   : > { %1333 = shalt.err (!%p1330_p12)
}
  0x92   : > { %1100 = dma.hbm_to_vmem [thread:$0]  (!%p1534_p6), %s1869_s6, 16, %s284_s28, [#allocation12]  }
  0x93   : > { %s799_s19 = sadd.s32 4294967294, %s1442_s27   ;;  %s1682_s11 = sadd.s32 1, %s1442_s27  }
  0x94   : > { %s30_s21 = ssub.s32 %s1442_s27, %s1682_s11  ;;  %s33_s13 = sadd.s32 1, %s1438_s26 }
  0x95   : > { %p31_p8 = scmp.eq.s32.totalorder %s30_s21, 0  ;;  %p40_p13 = scmp.ne.s32.totalorder %s1438_s26, %s1434_s25 }
  0x96   : > { %p41_p0 = scmp.eq.s32.totalorder %s1442_s27, 0  ;;  %p46_p1 = scmp.ne.s32.totalorder %s1434_s25, %s1430_s24 }
  0x97   : > { %s1693_s23 = scalar_select %p31_p8, %s1438_s26, %s33_s13  }
  0x98   : > { %p1695_p3 = por %p41_p0, %p40_p13  ;;  %p1878_p2 = scmp.eq.s32.totalorder %s1518_s30, 0 }
  0x99   : > { %p196_p5 = scmp.eq.s32.totalorder %s1518_s30, 1  ;;  %p202_p7 = scmp.eq.s32.totalorder %s799_s19, 1 }
  0x9a   : > { %p1701_p6 = por %p1878_p2, %p46_p1  ;;  %p1115_p9 = scmp.lt.s32.totalorder %s1442_s27, 2 }
  0x9b   : > { %s294_s22 = sand.u32 1, %s1438_s26   ;;  %p1708_p4 = por %p196_p5, %p40_p13 }
  0x9c   : > { %p1712_p10 = por %p202_p7, %p46_p1  ;;  %s808_s16 = sshll.u32 %s294_s22, 3 }
  0x9d   : > { %s1880_s12 = scalar_select %p1708_p4, 1, 0 }
  0x9e   : > { %s1881_s15 = scalar_select %p1712_p10, 1, 0 }
  0x9f   : > { %s809_s17 = sshll.u32 %s1442_s27, 7  ;;  %s298_s10 = scalar_lea.vmem [#allocation2], %s808_s16 }
  0xa0   : > { %s1720_s20 = scalar_lea.hbm %s1863_s0, %s809_s17  ;;  %s305_s9 = sshll.u32 %s298_s10, 4  ;;  %s1722_s9 = int_to_ptr.vmem [resolvable:$true] %s305_s9 }
  0xa1   : > { %p1726_p11 = pnand %p1115_p9, %p1695_p3  ;;  %s295_s21 = scalar_lea.sflag [#allocation3], %s294_s22 }
  0xa2   : > { %s1334_s13 = scalar_lea.hbm %s1720_s20, 128  ;;  %s1339_s18 = scalar_lea.hbm %s1863_s0, 256 }
  0xa3   : > { %p1335_p12 = scmp.ne.s32.totalorder %s1720_s20, %s1334_s13  ;;  %p1336_p8 = pneg %p1726_p11 }
  0xa4   : > { %p1340_p1 = scmp.lt.u32.totalorder %s1720_s20, %s1863_s0  ;;  %p1341_p3 = scmp.lt.u32.totalorder %s1339_s18, %s1334_s13 }
  0xa5   : > { %p1337_p13 = pnand %p1336_p8, %p1335_p12  ;;  %p1343_p5 = scmp.lt.u32.totalorder %s1334_s13, %s1720_s20 }
  0xa6   : > { %p1342_p2 = por %p1341_p3, %p1340_p1 }
  0xa7   : > { %p1338_p0 = pneg %p1337_p13 }
  0xa8   : > { %p1344_p7 = por %p1343_p5, %p1342_p2 }
  0xaa   : > { %p1345_p9 = pnand %p1344_p7, %p1338_p0 }
  0xac   : > { %1348 = shalt.err (!%p1345_p9)
}
  0xad   : > { %s1349_s22 = scalar_lea.vmem %s1722_s9, 128  ;;  %s1452_s10 = smov [#allocation2]  }
  0xae   : > { %p1350_p12 = scmp.ne.s32.totalorder %s1722_s9, %s1349_s22  ;;  %s1354_s16 = sshll.u32 %s1452_s10, 4  ;;  %s1355_s16 = int_to_ptr.vmem [resolvable:$false] %s1354_s16 }
  0xaf   : > { %s1356_s17 = scalar_lea.vmem %s1355_s16, 256  ;;  %p1357_p4 = scmp.lt.s32.totalorder %s1722_s9, %s1355_s16 }
  0xb0   : > { %p1352_p13 = pnand %p1350_p12, %p1336_p8  ;;  %p1358_p1 = scmp.lt.s32.totalorder %s1356_s17, %s1349_s22 }
  0xb2   : > { %p1353_p10 = pneg %p1352_p13  ;;  %p1359_p3 = por %p1358_p1, %p1357_p4 }
  0xb4   : > { %p1360_p2 = pnand %p1359_p3, %p1353_p10 }
  0xb6   : > { %1363 = shalt.err (!%p1360_p2)
}
  0xb7   : > { %1104 = dma.hbm_to_vmem [thread:$0]  (!%p1726_p11), %s1720_s20, 128, %s1722_s9, %s295_s21  }
  0xb8   : > { %p1883_p0 = scmp.ne.s32.totalorder %s1874_s8, 0 }
  0xb9   : > { %s1758_s13 = sand.u32 (!%p1883_p0), 1, %s1434_s25  }
  0xba   : > { %314 = sbr.rel (%p1883_p0) target bundleno = 897 (0x381), region = 48  ;;  %s811_s18 = sshll.u32 (!%p1883_p0), %s1758_s13, 3 }
  0xbb   : > { %s317_s29 = scalar_lea.sflag (!%p1883_p0), [#allocation3], %s1758_s13  ;;  %s1764_s14 = scalar_lea.vmem (!%p1883_p0), [#allocation2], %s811_s18 }
  0xc1   : > { %1409 = dma.done.wait (%p1701_p6), %s317_s29, 128  }
  0xc2   : > { %1411 = vsyncadd (%p1701_p6), %s317_s29, 4294967168  ;;  %p1884_p4 = scmp.eq.s32.totalorder %s1518_s30, 0 }
  0xc4   : > { %1413 = dma.done.wait (%p1884_p4), [#allocation6], 2064   ;;  %p1885_p10 = pmov %p1884_p4 }
  0xc5   : > { %p1886_p11 = pmov %p1884_p4 }
  0xc6   : > { %1415 = vsyncadd (%p1885_p10), [#allocation6], 4294965232 }
  0xc7   : > { %1417 = dma.done.wait (%p1886_p11), [#allocation9], 2064   ;;  %p1887_p8 = pmov %p1884_p4 }
  0xc8   : > { %p1888_p5 = pmov %p1884_p4 }
  0xc9   : > { %1419 = vsyncadd (%p1887_p8), [#allocation9], 4294965232 }
  0xca   : > { %1421 = dma.done.wait (%p1888_p5), [#allocation12], 2064   ;;  %p1889_p7 = pmov %p1884_p4 }
  0xcb   : > { %v1453_v0 = vmov 0.0|0.0   ;;  %vm1454_vm0 = vmmov 0   ;;  %v1455_v1 = vmov 0.0   ;;  %v376_v2 = vld [vmem:[#allocation5] sm:$0xff]  ;;  %v377_v3 = vld [vmem:[#allocation5 + $0x8] sm:$0xff]  ;;  %v378_v4 = vld [vmem:[#allocation5 + $0x10] sm:$0xff] }
  0xcc   : > { %1423 = vsyncadd (%p1889_p7), [#allocation12], 4294965232  ;;  %982 = vmatprep.subr.bf16.mxu0 %v1453_v0  ;;  %909 = vmatprep.mubr.msk.f32.mxu0 %vm1454_vm0, %v1455_v1  ;;  %v983_v5 = vpack.c.bf16 %v377_v3, %v376_v2  ;;  %v379_v6 = vld [vmem:[#allocation5 + $0x18] sm:$0xff]  ;;  %v380_v8 = vld [vmem:[#allocation5 + $0x20] sm:$0xff]  ;;  %s823_s8 = sshll.u32 %s1518_s30, 7  ;;  %s374_s28 = scalar_lea.vmem [#allocation14], %s811_s18 }
  0xcd   : > { %1006 = vmatprep.subr.bf16.mxu1 %v1453_v0  ;;  %944 = vmatprep.mubr.msk.f32.mxu1 %vm1454_vm0, %v1455_v1  ;;  %v986_v7 = vpack.c.bf16 %v379_v6, %v378_v4  ;;  %v381_v9 = vld [vmem:[#allocation5 + $0x28] sm:$0xff]  ;;  %v472_v12 = vld [vmem:[#allocation8 + $0x10] sm:$0xff]  ;;  %v473_v13 = vld [vmem:[#allocation8 + $0x18] sm:$0xff]  ;;  %s672_s20 = sshll.u32 %s374_s28, 4  ;;  %s1819_s21 = scalar_lea.hbm %s1870_s7, %s823_s8  ;;  %s1821_s20 = int_to_ptr.vmem [resolvable:$true] %s672_s20 }
  0xce   : > { %984 = vmatpush3.bf16.msra.mxu0 %v983_v5  ;;  %v470_v10 = vld [vmem:[#allocation8] sm:$0xff]  ;;  %v471_v11 = vld [vmem:[#allocation8 + $0x8] sm:$0xff]  ;;  %v989_v14 = vpack.c.bf16 %v381_v9, %v380_v8  ;;  %v383_v17 = vld [vmem:[#allocation5 + $0x38] sm:$0xff]  ;;  %v1010_v18 = vpack.c.bf16 %v473_v13, %v472_v12  ;;  %s659_s22 = scalar_lea.sflag [#allocation4], %s1758_s13  ;;  %s1364_s10 = scalar_lea.vmem %s1821_s20, 128 }
  0xcf   : > { %985 = vmatprep.subr.bf16.mxu0 %v1453_v0  ;;  %v1007_v15 = vpack.c.bf16 %v471_v11, %v470_v10  ;;  %v382_v16 = vld [vmem:[#allocation5 + $0x30] sm:$0xff]  ;;  %v474_v19 = vld [vmem:[#allocation8 + $0x20] sm:$0xff]  ;;  %v477_v26 = vld [vmem:[#allocation8 + $0x38] sm:$0xff]  ;;  %p1365_p6 = scmp.ne.s32.totalorder %s1821_s20, %s1364_s10  ;;  %p1890_p9 = scmp.ne.s32.totalorder %s1880_s12, 0 }
  0xd0   : > { %v475_v20 = vld [vmem:[#allocation8 + $0x28] sm:$0xff]  ;;  %v992_v21 = vpack.c.bf16 %v383_v17, %v382_v16  ;;  %v384_v22 = vld [vmem:[#allocation5 + $0x40] sm:$0xff]  ;;  %v476_v25 = vld [vmem:[#allocation8 + $0x30] sm:$0xff]  ;;  %s1456_s30 = smov [#allocation14]  }
  0xd1   : > { %1008 = vmatpush3.bf16.msra.mxu1 %v1007_v15  ;;  %v385_v23 = vld [vmem:[#allocation5 + $0x48] sm:$0xff]  ;;  %v1013_v24 = vpack.c.bf16 %v475_v20, %v474_v19  ;;  %v386_v28 = vld [vmem:[#allocation5 + $0x50] sm:$0xff]  ;;  %v387_v29 = vld [vmem:[#allocation5 + $0x58] sm:$0xff]  ;;  %v1016_v30 = vpack.c.bf16 %v477_v26, %v476_v25  ;;  %p1366_p12 = pnand %p1365_p6, %p1890_p9  ;;  %s1368_s16 = sshll.u32 %s1456_s30, 4  ;;  %s1369_s16 = int_to_ptr.vmem [resolvable:$false] %s1368_s16 }
  0xd2   : > { %987 = vmatpush3.bf16.msra.mxu0 %v986_v7  ;;  %1009 = vmatprep.subr.bf16.mxu1 %v1453_v0  ;;  %v995_v27 = vpack.c.bf16 %v385_v23, %v384_v22  ;;  %v478_v31 = vld [vmem:[#allocation8 + $0x40] sm:$0xff]  ;;  %v479_v32 = vld [vmem:[#allocation8 + $0x48] sm:$0xff]  ;;  %v998_v33 = vpack.c.bf16 %v387_v29, %v386_v28  ;;  %v480_v37 = vld [vmem:[#allocation8 + $0x50] sm:$0xff]  ;;  %s1370_s17 = scalar_lea.vmem %s1369_s16, 256  ;;  %p1371_p1 = scmp.lt.s32.totalorder %s1821_s20, %s1369_s16 }
  0xd3   : > { %988 = vmatprep.subr.bf16.mxu0 %v1453_v0  ;;  %v388_v34 = vld [vmem:[#allocation5 + $0x60] sm:$0xff]  ;;  %v389_v35 = vld [vmem:[#allocation5 + $0x68] sm:$0xff]  ;;  %v1019_v36 = vpack.c.bf16 %v479_v32, %v478_v31  ;;  %v390_v40 = vld [vmem:[#allocation5 + $0x70] sm:$0xff]  ;;  %p1367_p13 = pneg %p1366_p12  ;;  %p1372_p3 = scmp.lt.s32.totalorder %s1370_s17, %s1364_s10 }
  0xd4   : > { %v481_v38 = vld [vmem:[#allocation8 + $0x58] sm:$0xff]  ;;  %v1001_v39 = vpack.c.bf16 %v389_v35, %v388_v34  ;;  %v482_v43 = vld [vmem:[#allocation8 + $0x60] sm:$0xff]  ;;  %v483_v44 = vld [vmem:[#allocation8 + $0x68] sm:$0xff] }
  0xd5   : > { %1011 = vmatpush3.bf16.msra.mxu1 %v1010_v18  ;;  %v391_v41 = vld [vmem:[#allocation5 + $0x78] sm:$0xff]  ;;  %v1022_v42 = vpack.c.bf16 %v481_v38, %v480_v37  ;;  %v1025_v46 = vpack.c.bf16 %v483_v44, %v482_v43  ;;  %v564_v51 = vld [vmem:[#allocation11] sm:$0xff]  ;;  %v565_v52 = vld [vmem:[#allocation11 + $0x8] sm:$0xff]  ;;  %p1373_p2 = por %p1372_p3, %p1371_p1 }
  0xd6   : > { %990 = vmatpush3.bf16.msra.mxu0 %v989_v14  ;;  %1012 = vmatprep.subr.bf16.mxu1 %v1453_v0  ;;  %v1004_v45 = vpack.c.bf16 %v391_v41, %v390_v40  ;;  %v375_v47 = vld [vmem:[%s1764_s14] sm:$0xff]  ;;  %v1031_v54 = vpack.c.bf16 %v565_v52, %v564_v51  ;;  %v568_v57 = vld [vmem:[#allocation11 + $0x20] sm:$0xff]  ;;  %v819_v9 = vld [vmem:[#allocation7] ss:$0 sm:$0xff] }
  0xd7   : > { %991 = vmatprep.subr.bf16.mxu0 %v1453_v0  ;;  %v484_v48 = vld [vmem:[#allocation8 + $0x70] sm:$0xff]  ;;  %v485_v49 = vld [vmem:[#allocation8 + $0x78] sm:$0xff]  ;;  %v572_v63 = vld [vmem:[#allocation11 + $0x40] sm:$0xff]  ;;  %p1374_p0 = pnand %p1373_p2, %p1367_p13 }
  0xd8   : > { %v1028_v50 = vpack.c.bf16 %v485_v49, %v484_v48  ;;  %v566_v53 = vld [vmem:[#allocation11 + $0x10] sm:$0xff]  ;;  %v567_v55 = vld [vmem:[#allocation11 + $0x18] sm:$0xff]  ;;  %v569_v58 = vld [vmem:[#allocation11 + $0x28] sm:$0xff] }
  0xd9   : > { %1014 = vmatpush3.bf16.msra.mxu1 %v1013_v24  ;;  %v1034_v56 = vpack.c.bf16 %v567_v55, %v566_v53  ;;  %v1037_v59 = vpack.c.bf16 %v569_v58, %v568_v57  ;;  %v570_v60 = vld [vmem:[#allocation11 + $0x30] sm:$0xff]  ;;  %v571_v61 = vld [vmem:[#allocation11 + $0x38] sm:$0xff]  ;;  %v576_v6 = vld [vmem:[#allocation11 + $0x60] sm:$0xff] }
  0xda   : > { %993 = vmatpush3.bf16.msra.mxu0 %v992_v21  ;;  %1015 = vmatprep.subr.bf16.mxu1 %v1453_v0  ;;  %v1040_v62 = vpack.c.bf16 %v571_v61, %v570_v60  ;;  %v574_v3 = vld [vmem:[#allocation11 + $0x50] sm:$0xff]  ;;  %v575_v4 = vld [vmem:[#allocation11 + $0x58] sm:$0xff]  ;;  %v577_v7 = vld [vmem:[#allocation11 + $0x68] sm:$0xff] }
  0xdb   : > { %994 = vmatprep.subr.bf16.mxu0 %v1453_v0  ;;  %v1046_v5 = vpack.c.bf16 %v575_v4, %v574_v3  ;;  %v1049_v8 = vpack.c.bf16 %v577_v7, %v576_v6  ;;  %v578_v14 = vld [vmem:[#allocation11 + $0x70] sm:$0xff]  ;;  %v579_v15 = vld [vmem:[#allocation11 + $0x78] sm:$0xff] }
  0xdc   : > { %v1052_v16 = vpack.c.bf16 %v579_v15, %v578_v14  ;;  %v820_v17 = vld [vmem:[#allocation10] ss:$0 sm:$0xff] }
  0xdd   : > { %1017 = vmatpush3.bf16.msra.mxu1 %v1016_v30 }
  0xde   : > { %996 = vmatpush3.bf16.msra.mxu0 %v995_v27  ;;  %1018 = vmatprep.subr.bf16.mxu1 %v1453_v0 }
  0xdf   : > { %997 = vmatprep.subr.bf16.mxu0 %v1453_v0 }
  0xe1   : > { %1020 = vmatpush3.bf16.msra.mxu1 %v1019_v36 }
  0xe2   : > { %999 = vmatpush3.bf16.msra.mxu0 %v998_v33  ;;  %1021 = vmatprep.subr.bf16.mxu1 %v1453_v0 }
  0xe3   : > { %1000 = vmatprep.subr.bf16.mxu0 %v1453_v0 }
  0xe5   : > { %1023 = vmatpush3.bf16.msra.mxu1 %v1022_v42 }
  0xe6   : > { %1002 = vmatpush3.bf16.msra.mxu0 %v1001_v39  ;;  %1024 = vmatprep.subr.bf16.mxu1 %v1453_v0 }
  0xe7   : > { %1003 = vmatprep.subr.bf16.mxu0 %v1453_v0 }
  0xe9   : > { %1026 = vmatpush3.bf16.msra.mxu1 %v1025_v46 }
  0xea   : > { %1005 = vmatpush3.bf16.msra.mxu0 %v1004_v45  ;;  %1027 = vmatprep.subr.bf16.mxu1 %v1453_v0 }
  0xeb   : > { %1030 = vmatprep.subr.bf16.mxu0 %v1453_v0 }
  0xed   : > { %910 = vmatmul.mubr.f32.vlgmr.msra.gmra.mrb[0].mxu0 %v375_v47  ;;  %1029 = vmatpush3.bf16.msra.mxu1 %v1028_v50 }
  0xee   : > { %979 = vmatprep.mubr.msk.f32.mxu0 %vm1454_vm0, %v1455_v1  ;;  %1032 = vmatpush3.bf16.msra.mxu0 %v1031_v54  ;;  %v573_v1 = vld [vmem:[#allocation11 + $0x48] sm:$0xff] }
  0xef   : > { %1033 = vmatprep.subr.bf16.mxu0 %v1453_v0  ;;  %v1043_v2 = vpack.c.bf16 %v573_v1, %v572_v63 }
  0xf2   : > { %1035 = vmatpush3.bf16.msra.mxu0 %v1034_v56 }
  0xf3   : > { %1036 = vmatprep.subr.bf16.mxu0 %v1453_v0 }
  0xf6   : > { %1038 = vmatpush3.bf16.msra.mxu0 %v1037_v59 }
  0xf7   : > { %1039 = vmatprep.subr.bf16.mxu0 %v1453_v0 }
  0xfa   : > { %1041 = vmatpush3.bf16.msra.mxu0 %v1040_v62 }
  0xfb   : > { %1042 = vmatprep.subr.bf16.mxu0 %v1453_v0 }
  0xfe   : > { %1044 = vmatpush3.bf16.msra.mxu0 %v1043_v2 }
  0xff   : > { %1045 = vmatprep.subr.bf16.mxu0 %v1453_v0 }
 0x102   : > { %1047 = vmatpush3.bf16.msra.mxu0 %v1046_v5 }
 0x103   : > { %1048 = vmatprep.subr.bf16.mxu0 %v1453_v0 }
 0x106   : > { %1050 = vmatpush3.bf16.msra.mxu0 %v1049_v8 }
 0x107   : > { %1051 = vmatprep.subr.bf16.mxu0 %v1453_v0  ;;  %v821_v0 = vld [vmem:[#allocation13] ss:$0 sm:$0xff] }
 0x10a   : > { %1053 = vmatpush3.bf16.msra.mxu0 %v1052_v16 }
 0x1c0   : > { %v465_v10 = vpop.f32.mrb[0].mxu0 }
 0x1c1   : > { %v466_v11 = vadd.f32 %v819_v9, %v465_v10  ;;  %v911_v12 = vpop.f32.mrb[1].mxu0 }
 0x1c3   : > { %v469_v13 = vmax.f32 %v466_v11, 0.0 }
 0x1c5   : > { %945 = vmatmul.mubr.f32.vlgmr.msra.gmra.mrb[0].mxu1 %v469_v13 }
 0x298   : > { %v559_v18 = vpop.f32.mrb[0].mxu1 }
 0x299   : > { %v560_v19 = vadd.f32 %v820_v17, %v559_v18  ;;  %v946_v20 = vpop.f32.mrb[1].mxu1 }
 0x29b   : > { %v563_v21 = vmax.f32 %v560_v19, 0.0 }
 0x29d   : > { %980 = vmatmul.mubr.f32.vlgmr.msra.gmra.mrb[2].mxu0 %v563_v21 }
 0x370   : > { %v653_v22 = vpop.f32.mrb[2].mxu0 }
 0x371   : > { %v654_v23 = vadd.f32 %v821_v0, %v653_v22  ;;  %v981_v24 = vpop.f32.mrb[3].mxu0 }
 0x373   : > { %657 = vst [vmem:[%s374_s28] sm:$0xff] %v654_v23 }
 0x374   : > { %1377 = shalt.err (!%p1374_p0)
}
 0x375   : > { %s1378_s13 = scalar_lea.hbm %s1819_s21, 128  ;;  %s1382_s14 = scalar_lea.hbm %s1870_s7, 256 }
 0x376   : > { %p1379_p4 = scmp.ne.s32.totalorder %s1819_s21, %s1378_s13  ;;  %p1383_p8 = scmp.lt.u32.totalorder %s1819_s21, %s1870_s7 }
 0x377   : > { %p1384_p5 = scmp.lt.u32.totalorder %s1382_s14, %s1378_s13  ;;  %p1386_p6 = scmp.lt.u32.totalorder %s1378_s13, %s1819_s21 }
 0x378   : > { %p1380_p10 = pnand %p1379_p4, %p1890_p9 }
 0x379   : > { %p1385_p7 = por %p1384_p5, %p1383_p8 }
 0x37a   : > { %p1381_p11 = pneg %p1380_p10 }
 0x37b   : > { %p1387_p12 = por %p1386_p6, %p1385_p7 }
 0x37d   : > { %p1388_p13 = pnand %p1387_p12, %p1381_p11 }
 0x37f   : > { %1391 = shalt.err (!%p1388_p13)
}
 0x380   : > { %1080 = dma.vmem_to_hbm [thread:$0]  (%p1890_p9), %s1821_s20, 128, %s1819_s21, %s659_s22  }
 0x381 PF: > { %s684_s9 = sand.u32 1, %s1430_s24   ;;  %p1891_p1 = scmp.ne.s32.totalorder %s1881_s15, 0 }
 0x382   : > { %p1892_p3 = scmp.ge.s32.totalorder %s1442_s27, 2  ;;  %s685_s19 = scalar_lea.sflag [#allocation4], %s684_s9 }
 0x384   : > { %p1106_p2 = pnand %p1892_p3, %p1891_p1 }
 0x386   : > { %1425 = dma.done.wait (!%p1106_p2), %s685_s19, 128  }
 0x387   : > { %1427 = vsyncadd (!%p1106_p2), %s685_s19, 4294967168  ;;  %p23_p0 = scmp.ge.s32.totalorder %s1682_s11, 4   ;;  %s1893_s24 = smov %s1434_s25 }
 0x388   : > { %s1894_s25 = smov %s1438_s26  ;;  %s1895_s26 = smov %s1693_s23 }
 0x389   : > { %s1896_s27 = smov %s1682_s11  ;;  %25 = sbr.rel (!%p23_p0) target bundleno = 8 (0x8), region = 117 }
 0x390   :  { %690 = vsyncpa [#allocation3], 1 }
 0x391   :  { %692 = vsyncpa [#allocation3 + $0x1], 1 }
 0x392   :  { %693 = vsyncpa [#allocation6], 1 }
 0x393   :  { %694 = vsyncpa [#allocation9], 1 }
 0x394   :  { %695 = vsyncpa [#allocation12], 1 }
 0x395   :  { %696 = vsyncpa [#allocation4], 1 }
 0x396   :  { %698 = vsyncpa [#allocation4 + $0x1], 1 }

</bundles_post_ra>
